<compile_context>
chip_gen: v5e
topology: v5e:2x2
jax: 0.10.0
libtpu: 0.0.40
codegen_flags: <defaults>
</compile_context>

<pallas_src>
import math

import jax
import jax.numpy as jnp
from jax import lax
from jax.experimental import pallas as pl
from jax.experimental.pallas import tpu as pltpu

# Small, module-consistent hyper-parameters (d_model=512, d_k=d_v=64, h=8, d_ff=2048 scaled
# down, keeping d_model = h*d_k = 128 so every slab is lane-dense).
D_MODEL = 128
D_K = 32
D_V = 32
H = 4
D_FF = 256
LN_EPS = 1e-5
NEG = -1e30          # large finite negative: same softmax result as -inf, no NaN on full masks
VECS_W = 3 * H * D_K  # width of the packed bias/LN slab (= fused qkv bias width)


def _round8(n):
    return (n + 7) // 8 * 8


# ----------------------------------- kernel -----------------------------------
def decoder_layer_kernel(x_ref, enc_ref, mask_pad_ref, kpad_self_ref, bias_enc_ref,
                         wqkv_ref, wo_ref, w1_ref, w2_ref, vecs_ref, out_ref):
    NQ = x_ref.shape[1]                  # padded decoder length (block is one batch element)
    NK = enc_ref.shape[1]                # padded encoder length
    QK = H * D_K
    HV = H * D_V

    x2 = x_ref[0]                        # (NQ, D_MODEL) lane-dense slab
    enc2 = enc_ref[0]                    # (NK, D_MODEL)

    # hoisted once: pad-mask broadcast reused by all three residual blocks
    mp = jnp.broadcast_to(mask_pad_ref[0], (NQ, D_MODEL))

    # additive masks (0 / -1e30). Causal part generated in-kernel (no O(seq^2) HBM traffic);
    # the per-key padding parts arrive pre-converted to additive form.
    rows = lax.broadcasted_iota(jnp.int32, (NQ, NQ), 0)
    cols = lax.broadcasted_iota(jnp.int32, (NQ, NQ), 1)
    bias_self = (cols > rows).astype(jnp.float32) * NEG + kpad_self_ref[0]   # (NQ, NQ)
    bias_enc = bias_enc_ref[0]                                               # (1, NK)

    wqkv = wqkv_ref[...]                 # (2*D_MODEL, 3*QK)  [self | enc stacked on rows]
    wo = wo_ref[...]                     # (2*HV, D_MODEL)
    w1 = w1_ref[...]                     # (D_MODEL, D_FF)
    w2 = w2_ref[...]                     # (D_FF, D_MODEL)
    vecs = vecs_ref[...]                 # (12, VECS_W) packed biases / LN params

    wqkv_s, wqkv_e = wqkv[:D_MODEL], wqkv[D_MODEL:]
    wo_s, wo_e = wo[:HV], wo[HV:]
    bqkv_s = vecs[0:1, :]
    bo_s, lng_s, lnb_s = vecs[1:2, :D_MODEL], vecs[2:3, :D_MODEL], vecs[3:4, :D_MODEL]
    bqkv_e = vecs[4:5, :]
    bo_e, lng_e, lnb_e = vecs[5:6, :D_MODEL], vecs[6:7, :D_MODEL], vecs[7:8, :D_MODEL]
    b1_f = vecs[8:9, :D_FF]
    b2_f, lng_f, lnb_f = vecs[9:10, :D_MODEL], vecs[10:11, :D_MODEL], vecs[11:12, :D_MODEL]

    def layer_norm(y, g, b):
        mu = jnp.mean(y, axis=-1, keepdims=True)
        var = jnp.mean(jnp.square(y - mu), axis=-1, keepdims=True)
        return (y - mu) * lax.rsqrt(var + LN_EPS) * g + b

    def heads_split(t, d):
        # (rows, H*d) -> head-major (H, rows, d): one relayout per tensor per call,
        # enabling a single batched einsum over all heads.
        return jnp.stack([t[:, i * d:(i + 1) * d] for i in range(H)], axis=0)

    def mha(q_in, kv_in, bias, w_qkv, b_qkv, w_o, b_o, self_att):
        # Fused projections (1/sqrt(d_k) scale already folded into the Q columns).
        if self_att:                      # q, k, v all from the same input -> one matmul
            qkv = jnp.dot(q_in, w_qkv, preferred_element_type=jnp.float32) + b_qkv
            q_all, k_all, v_all = qkv[:, :QK], qkv[:, QK:2 * QK], qkv[:, 2 * QK:]
        else:                             # cross-attention: Q matmul + fused K|V matmul
            q_all = (jnp.dot(q_in, w_qkv[:, :QK], preferred_element_type=jnp.float32)
                     + b_qkv[:, :QK])
            kv = (jnp.dot(kv_in, w_qkv[:, QK:], preferred_element_type=jnp.float32)
                  + b_qkv[:, QK:])
            k_all, v_all = kv[:, :QK], kv[:, QK:]

        q_hm = heads_split(q_all, D_K)    # (H, nq, D_K)
        k_hm = heads_split(k_all, D_K)    # (H, nk, D_K)
        v_hm = heads_split(v_all, D_V)    # (H, nk, D_V)

        # ONE batched score einsum / softmax / PV einsum over all heads.
        s = jnp.einsum('hqd,hkd->hqk', q_hm, k_hm,
                       preferred_element_type=jnp.float32) + bias
        s = s - jnp.max(s, axis=-1, keepdims=True)
        p = jnp.exp(s)
        # Fully-masked rows become uniform (finite) -- safe because mask_pad zeroes them later.
        p = p * pl.reciprocal(jnp.sum(p, axis=-1, keepdims=True), approx=True)
        oh = jnp.einsum('hqk,hkd->hqd', p, v_hm,
                        preferred_element_type=jnp.float32)           # (H, nq, D_V)

        # Pack heads into a contiguous (nq, H*D_V) slab -> SINGLE Wo matmul (contraction HV).
        o_cat = jnp.concatenate([oh[i] for i in range(H)], axis=-1)
        return jnp.dot(o_cat, w_o, preferred_element_type=jnp.float32) + b_o

    # ---- self attention (+ residual, layer norm), then pad mask ----
    sa = layer_norm(x2 + mha(x2, x2, bias_self, wqkv_s, bqkv_s, wo_s, bo_s, True),
                    lng_s, lnb_s) * mp

    # ---- encoder attention (+ residual, layer norm), then pad mask ----
    ea = layer_norm(sa + mha(sa, enc2, bias_enc, wqkv_e, bqkv_e, wo_e, bo_e, False),
                    lng_e, lnb_e) * mp

    # ---- position-wise feed forward (+ residual, layer norm), then pad mask ----
    h1 = jnp.maximum(jnp.dot(ea, w1, preferred_element_type=jnp.float32) + b1_f, 0.0)
    h2 = jnp.dot(h1, w2, preferred_element_type=jnp.float32) + b2_f
    out_ref[0] = layer_norm(ea + h2, lng_f, lnb_f) * mp   # lane-dense (NQ, 128) store


# ---------------------------------- wrapper -----------------------------------
def _cost_estimate(B, nq, nk):
    QK, HV = H * D_K, H * D_V
    mm = 0
    mm += 2 * nq * D_MODEL * (3 * QK)            # fused self QKV
    mm += 2 * H * nq * nq * D_K * 2              # self scores + PV
    mm += 2 * nq * HV * D_MODEL                  # self Wo
    mm += 2 * nq * D_MODEL * QK                  # cross Q
    mm += 2 * nk * D_MODEL * (2 * QK)            # cross fused KV
    mm += 2 * H * nq * nk * D_K * 2              # cross scores + PV
    mm += 2 * nq * HV * D_MODEL                  # cross Wo
    mm += 2 * nq * D_MODEL * D_FF * 2            # FFN
    flops = B * mm
    transcendentals = B * (H * nq * (nq + nk) + 6 * nq)
    weight_bytes = 4 * (2 * D_MODEL * 3 * QK + 2 * HV * D_MODEL
                        + 2 * D_MODEL * D_FF + 12 * VECS_W)
    act_bytes = 4 * B * (2 * nq * D_MODEL + nk * D_MODEL + nq * (nq + 1) + nk)
    return pl.CostEstimate(flops=flops, transcendentals=transcendentals,
                           bytes_accessed=weight_bytes + act_bytes)


@jax.jit
def decoder_layer(x, enc, mask_pad, mask_self_kpad, mask_enc, packed):
    """x:(B,nq,d) enc:(B,nk,d) mask_pad:(B,nq,1) mask_self_kpad:(B,1,nq) mask_enc:(B,1,nk).

    mask_self_kpad is the key-padding component of the self-attention mask (1 = masked);
    the causal component is generated inside the kernel.
    """
    wqkv, wo, w1, w2, vecs = packed
    B, nq, d = x.shape
    nk = enc.shape[1]
    nq_p, nk_p = _round8(nq), _round8(nk)
    QK = H * D_K

    # Pad sequence dims to sublane multiples; padded keys are disabled via the additive
    # biases, padded query rows are zeroed by mask_pad and sliced off at the end.
    x_p = jnp.pad(x, ((0, 0), (0, nq_p - nq), (0, 0)))
    enc_p = jnp.pad(enc, ((0, 0), (0, nk_p - nk), (0, 0)))
    mask_pad_p = jnp.pad(mask_pad.astype(jnp.float32), ((0, 0), (0, nq_p - nq), (0, 0)))

    # binary masks (1 = masked out) -> additive biases (0 / -1e30)
    kpad_self = jnp.pad(mask_self_kpad.astype(jnp.float32) * NEG,
                        ((0, 0), (0, 0), (0, nq_p - nq)), constant_values=NEG)
    bias_enc = jnp.pad(mask_enc.astype(jnp.float32) * NEG,
                       ((0, 0), (0, 0), (0, nk_p - nk)), constant_values=NEG)

    out = pl.pallas_call(
        decoder_layer_kernel,
        out_shape=jax.ShapeDtypeStruct((B, nq_p, d), jnp.float32),
        grid=(B,),                                            # one batch element per step
        in_specs=[
            pl.BlockSpec((1, nq_p, d), lambda b: (b, 0, 0)),          # x
            pl.BlockSpec((1, nk_p, d), lambda b: (b, 0, 0)),          # enc
            pl.BlockSpec((1, nq_p, 1), lambda b: (b, 0, 0)),          # mask_pad
            pl.BlockSpec((1, 1, nq_p), lambda b: (b, 0, 0)),          # self key-pad bias
            pl.BlockSpec((1, 1, nk_p), lambda b: (b, 0, 0)),          # enc key-pad bias
            pl.BlockSpec((2 * D_MODEL, 3 * QK), lambda b: (0, 0)),    # fused QKV weight
            pl.BlockSpec((2 * H * D_V, D_MODEL), lambda b: (0, 0)),   # Wo (self|enc)
            pl.BlockSpec((D_MODEL, D_FF), lambda b: (0, 0)),          # FFN W1
            pl.BlockSpec((D_FF, D_MODEL), lambda b: (0, 0)),          # FFN W2
            pl.BlockSpec((12, VECS_W), lambda b: (0, 0)),             # packed biases / LN
        ],
        out_specs=pl.BlockSpec((1, nq_p, d), lambda b: (b, 0, 0)),
        compiler_params=pltpu.CompilerParams(dimension_semantics=("parallel",)),
        cost_estimate=_cost_estimate(B, nq_p, nk_p),
    )(x_p, enc_p, mask_pad_p, kpad_self, bias_enc, wqkv, wo, w1, w2, vecs)
    return out[:, :nq]


# ------------------------------ parameter setup --------------------------------
def _linear(key, fan_in, fan_out):
    k1, k2 = jax.random.split(key)
    bound = 1.0 / math.sqrt(fan_in)
    w = jax.random.uniform(k1, (fan_in, fan_out), jnp.float32, -bound, bound)
    b = jax.random.uniform(k2, (1, fan_out), jnp.float32, -bound, bound)
    return w, b


def init_raw_params(key):
    ks = jax.random.split(key, 10)
    params = []
    # self attention: fc_q, fc_k, fc_v, fc_o, layer_norm
    for i, (fi, fo) in enumerate([(D_MODEL, H * D_K), (D_MODEL, H * D_K),
                                  (D_MODEL, H * D_V), (H * D_V, D_MODEL)]):
        params += list(_linear(ks[i], fi, fo))
    params += [jnp.ones((1, D_MODEL), jnp.float32), jnp.zeros((1, D_MODEL), jnp.float32)]
    # enc attention
    for i, (fi, fo) in enumerate([(D_MODEL, H * D_K), (D_MODEL, H * D_K),
                                  (D_MODEL, H * D_V), (H * D_V, D_MODEL)]):
        params += list(_linear(ks[4 + i], fi, fo))
    params += [jnp.ones((1, D_MODEL), jnp.float32), jnp.zeros((1, D_MODEL), jnp.float32)]
    # position-wise feed forward: fc1, fc2, layer_norm
    params += list(_linear(ks[8], D_MODEL, D_FF))
    params += list(_linear(ks[9], D_FF, D_MODEL))
    params += [jnp.ones((1, D_MODEL), jnp.float32), jnp.zeros((1, D_MODEL), jnp.float32)]
    return params


def pack_params(raw):
    (wq_s, bq_s, wk_s, bk_s, wv_s, bv_s, wo_s, bo_s, lng_s, lnb_s,
     wq_e, bq_e, wk_e, bk_e, wv_e, bv_e, wo_e, bo_e, lng_e, lnb_e,
     w1_f, b1_f, w2_f, b2_f, lng_f, lnb_f) = raw
    scale = 1.0 / math.sqrt(D_K)            # folded into Wq / bq -> no per-head scaling

    wqkv = jnp.concatenate([
        jnp.concatenate([wq_s * scale, wk_s, wv_s], axis=1),
        jnp.concatenate([wq_e * scale, wk_e, wv_e], axis=1)], axis=0)   # (2*D_MODEL, 3*H*D_K)
    wo = jnp.concatenate([wo_s, wo_e], axis=0)                          # (2*H*D_V, D_MODEL)

    def row(v):
        v = v.reshape(1, -1)
        return jnp.pad(v, ((0, 0), (0, VECS_W - v.shape[1])))

    vecs = jnp.concatenate([
        row(jnp.concatenate([bq_s * scale, bk_s, bv_s], axis=1)),
        row(bo_s), row(lng_s), row(lnb_s),
        row(jnp.concatenate([bq_e * scale, bk_e, bv_e], axis=1)),
        row(bo_e), row(lng_e), row(lnb_e),
        row(b1_f), row(b2_f), row(lng_f), row(lnb_f)], axis=0)          # (12, VECS_W)

    return wqkv, wo, w1_f, w2_f, vecs


# --------------------------- pure-JAX reference check --------------------------
def reference(x, enc, mask_pad, mask_self, mask_enc, raw):
    (wq_s, bq_s, wk_s, bk_s, wv_s, bv_s, wo_s, bo_s, lng_s, lnb_s,
     wq_e, bq_e, wk_e, bk_e, wv_e, bv_e, wo_e, bo_e, lng_e, lnb_e,
     w1_f, b1_f, w2_f, b2_f, lng_f, lnb_f) = raw
    scale = 1.0 / math.sqrt(D_K)

    def ln(y, g, b):
        mu = jnp.mean(y, axis=-1, keepdims=True)
        var = jnp.mean(jnp.square(y - mu), axis=-1, keepdims=True)
        return (y - mu) * lax.rsqrt(var + LN_EPS) * g + b

    def mha(xq, xkv, mask, wq, bq, wk, bk, wv, bv, wo, bo):
        q = xq @ wq + bq
        k = xkv @ wk + bk
        v = xkv @ wv + bv
        heads = []
        for i in range(H):
            att = (q[:, i * D_K:(i + 1) * D_K] @ k[:, i * D_K:(i + 1) * D_K].T) * scale
            att = jnp.where(mask > 0, NEG, att)
            p = jax.nn.softmax(att, axis=-1)
            heads.append(p @ v[:, i * D_V:(i + 1) * D_V])
        return jnp.concatenate(heads, axis=-1) @ wo + bo

    def one(xb, encb, mpb, msb, meb):
        sa = ln(xb + mha(xb, xb, msb, wq_s, bq_s, wk_s, bk_s, wv_s, bv_s, wo_s, bo_s),
                lng_s, lnb_s) * mpb
        ea = ln(sa + mha(sa, encb, meb, wq_e, bq_e, wk_e, bk_e, wv_e, bv_e, wo_e, bo_e),
                lng_e, lnb_e) * mpb
        h1 = jnp.maximum(ea @ w1_f + b1_f, 0.0)
        return ln(ea + (h1 @ w2_f + b2_f), lng_f, lnb_f) * mpb

    return jax.vmap(one)(x, enc, mask_pad, mask_self, mask_enc)


# ------------------------------------ main -------------------------------------
if __name__ == "__main__":
    B, NQ, NK = 2, 8, 10
    key = jax.random.PRNGKey(0)
    k_x, k_e, k_p = jax.random.split(key, 3)

    x = jax.random.normal(k_x, (B, NQ, D_MODEL), jnp.float32)
    enc = jax.random.normal(k_e, (B, NK, D_MODEL), jnp.float32)

    # self-attention mask = causal OR decoder key-padding (batch 1: last 2 positions padded)
    causal = (jnp.arange(NQ)[None, :] > jnp.arange(NQ)[:, None]).astype(jnp.float32)
    mask_self_kpad = jnp.zeros((B, 1, NQ), jnp.float32).at[1, 0, NQ - 2:].set(1.0)
    mask_self_full = jnp.maximum(jnp.broadcast_to(causal, (B, NQ, NQ)), mask_self_kpad)

    # encoder padding mask: batch 1 has last 3 encoder positions masked
    mask_enc = jnp.zeros((B, 1, NK), jnp.float32).at[1, 0, NK - 3:].set(1.0)

    # pad mask on the decoder queries: batch 1 has last 2 positions padded
    mask_pad = jnp.ones((B, NQ, 1), jnp.float32).at[1, NQ - 2:, 0].set(0.0)

    raw = init_raw_params(k_p)
    packed = pack_params(raw)

    out = jax.block_until_ready(
        decoder_layer(x, enc, mask_pad, mask_self_kpad, mask_enc, packed))
    ref = jax.block_until_ready(
        reference(x, enc, mask_pad, mask_self_full, mask_enc, raw))

    assert out.shape == (B, NQ, D_MODEL)
    # tolerance leaves headroom for the approx (EUP) reciprocal in the softmax denominator
    assert bool(jnp.allclose(out, ref, atol=5e-3, rtol=5e-3)), "Pallas output mismatch vs reference"

    print("KERNEL_OK")
</pallas_src>

<mosaic_0001>
module attributes {stable_mosaic.version = 11 : i64} {
  func.func @decoder_layer_kernel(%arg0: i32, %arg1: memref<1x8x128xf32, #tpu.memory_space<vmem>>, %arg2: memref<1x16x128xf32, #tpu.memory_space<vmem>>, %arg3: memref<1x8x1xf32, #tpu.memory_space<vmem>>, %arg4: memref<1x1x8xf32, #tpu.memory_space<vmem>>, %arg5: memref<1x1x16xf32, #tpu.memory_space<vmem>>, %arg6: memref<256x384xf32, #tpu.memory_space<vmem>>, %arg7: memref<256x128xf32, #tpu.memory_space<vmem>>, %arg8: memref<128x256xf32, #tpu.memory_space<vmem>>, %arg9: memref<256x128xf32, #tpu.memory_space<vmem>>, %arg10: memref<12x384xf32, #tpu.memory_space<vmem>>, %arg11: memref<1x8x128xf32, #tpu.memory_space<vmem>>) attributes {dimension_semantics = [#tpu.dimension_semantics<parallel>], iteration_bounds = array<i64: 2>, scalar_prefetch = 0 : i64, scratch_operands = 0 : i64, tpu.core_type = #tpu.core_type<tc>, window_params = [{transform_indices = @transform_0, window_bounds = array<i64: 1, 8, 128>}, {transform_indices = @transform_1, window_bounds = array<i64: 1, 16, 128>}, {transform_indices = @transform_2, window_bounds = array<i64: 1, 8, 1>}, {transform_indices = @transform_3, window_bounds = array<i64: 1, 1, 8>}, {transform_indices = @transform_4, window_bounds = array<i64: 1, 1, 16>}, {pipeline_mode = #tpu.pipeline_mode<synchronous>, transform_indices = @transform_5, window_bounds = array<i64: 256, 384>}, {pipeline_mode = #tpu.pipeline_mode<synchronous>, transform_indices = @transform_6, window_bounds = array<i64: 256, 128>}, {pipeline_mode = #tpu.pipeline_mode<synchronous>, transform_indices = @transform_7, window_bounds = array<i64: 128, 256>}, {pipeline_mode = #tpu.pipeline_mode<synchronous>, transform_indices = @transform_8, window_bounds = array<i64: 256, 128>}, {pipeline_mode = #tpu.pipeline_mode<synchronous>, transform_indices = @transform_9, window_bounds = array<i64: 12, 384>}, {transform_indices = @transform_10, window_bounds = array<i64: 1, 8, 128>}]} {
    %c0 = arith.constant 0 : index
    %c0_0 = arith.constant 0 : index
    %c0_1 = arith.constant 0 : index
    %0 = vector.load %arg1[%c0, %c0_0, %c0_1] : memref<1x8x128xf32, #tpu.memory_space<vmem>>, vector<1x8x128xf32>
    %1 = vector.shape_cast %0 : vector<1x8x128xf32> to vector<8x128xf32>
    %c0_2 = arith.constant 0 : index
    %c0_3 = arith.constant 0 : index
    %c0_4 = arith.constant 0 : index
    %2 = vector.load %arg2[%c0_2, %c0_3, %c0_4] : memref<1x16x128xf32, #tpu.memory_space<vmem>>, vector<1x16x128xf32>
    %3 = vector.shape_cast %2 : vector<1x16x128xf32> to vector<16x128xf32>
    %c0_5 = arith.constant 0 : index
    %c0_6 = arith.constant 0 : index
    %c0_7 = arith.constant 0 : index
    %4 = vector.load %arg3[%c0_5, %c0_6, %c0_7] : memref<1x8x1xf32, #tpu.memory_space<vmem>>, vector<1x8x1xf32>
    %5 = vector.shape_cast %4 : vector<1x8x1xf32> to vector<8x1xf32>
    %6 = vector.shape_cast %5 : vector<8x1xf32> to vector<8x1xf32>
    %7 = vector.broadcast %6 : vector<8x1xf32> to vector<8x128xf32>
    %8 = tpu.iota {dimensions = array<i32: 0>} : vector<8x8xi32>
    %9 = tpu.iota {dimensions = array<i32: 1>} : vector<8x8xi32>
    %10 = arith.cmpi sgt, %9, %8 : vector<8x8xi32>
    %11 = arith.extui %10 : vector<8x8xi1> to vector<8x8xi32>
    %12 = arith.sitofp %11 : vector<8x8xi32> to vector<8x8xf32>
    %cst = arith.constant -1.000000e+30 : f32
    %13 = vector.broadcast %cst : f32 to vector<8x8xf32>
    %14 = arith.mulf %12, %13 : vector<8x8xf32>
    %c0_8 = arith.constant 0 : index
    %c0_9 = arith.constant 0 : index
    %c0_10 = arith.constant 0 : index
    %15 = vector.load %arg4[%c0_8, %c0_9, %c0_10] : memref<1x1x8xf32, #tpu.memory_space<vmem>>, vector<1x1x8xf32>
    %16 = vector.shape_cast %15 : vector<1x1x8xf32> to vector<1x8xf32>
    %17 = vector.broadcast %16 : vector<1x8xf32> to vector<8x8xf32>
    %18 = arith.addf %14, %17 : vector<8x8xf32>
    %c0_11 = arith.constant 0 : index
    %c0_12 = arith.constant 0 : index
    %c0_13 = arith.constant 0 : index
    %19 = vector.load %arg5[%c0_11, %c0_12, %c0_13] : memref<1x1x16xf32, #tpu.memory_space<vmem>>, vector<1x1x16xf32>
    %20 = vector.shape_cast %19 : vector<1x1x16xf32> to vector<1x16xf32>
    %c0_14 = arith.constant 0 : index
    %c0_15 = arith.constant 0 : index
    %21 = vector.load %arg6[%c0_14, %c0_15] : memref<256x384xf32, #tpu.memory_space<vmem>>, vector<256x384xf32>
    %c0_16 = arith.constant 0 : index
    %c0_17 = arith.constant 0 : index
    %22 = vector.load %arg7[%c0_16, %c0_17] : memref<256x128xf32, #tpu.memory_space<vmem>>, vector<256x128xf32>
    %c0_18 = arith.constant 0 : index
    %c0_19 = arith.constant 0 : index
    %23 = vector.load %arg8[%c0_18, %c0_19] : memref<128x256xf32, #tpu.memory_space<vmem>>, vector<128x256xf32>
    %c0_20 = arith.constant 0 : index
    %c0_21 = arith.constant 0 : index
    %24 = vector.load %arg9[%c0_20, %c0_21] : memref<256x128xf32, #tpu.memory_space<vmem>>, vector<256x128xf32>
    %c0_22 = arith.constant 0 : index
    %c0_23 = arith.constant 0 : index
    %25 = vector.load %arg10[%c0_22, %c0_23] : memref<12x384xf32, #tpu.memory_space<vmem>>, vector<12x384xf32>
    %26 = vector.extract_strided_slice %21 {offsets = [0, 0], sizes = [128, 384], strides = [1, 1]} : vector<256x384xf32> to vector<128x384xf32>
    %27 = vector.extract_strided_slice %21 {offsets = [128, 0], sizes = [128, 384], strides = [1, 1]} : vector<256x384xf32> to vector<128x384xf32>
    %28 = vector.extract_strided_slice %22 {offsets = [0, 0], sizes = [128, 128], strides = [1, 1]} : vector<256x128xf32> to vector<128x128xf32>
    %29 = vector.extract_strided_slice %22 {offsets = [128, 0], sizes = [128, 128], strides = [1, 1]} : vector<256x128xf32> to vector<128x128xf32>
    %30 = vector.extract_strided_slice %25 {offsets = [0, 0], sizes = [1, 384], strides = [1, 1]} : vector<12x384xf32> to vector<1x384xf32>
    %31 = vector.extract_strided_slice %25 {offsets = [1, 0], sizes = [1, 128], strides = [1, 1]} : vector<12x384xf32> to vector<1x128xf32>
    %32 = vector.extract_strided_slice %25 {offsets = [2, 0], sizes = [1, 128], strides = [1, 1]} : vector<12x384xf32> to vector<1x128xf32>
    %33 = vector.extract_strided_slice %25 {offsets = [3, 0], sizes = [1, 128], strides = [1, 1]} : vector<12x384xf32> to vector<1x128xf32>
    %34 = vector.extract_strided_slice %25 {offsets = [4, 0], sizes = [1, 384], strides = [1, 1]} : vector<12x384xf32> to vector<1x384xf32>
    %35 = vector.extract_strided_slice %25 {offsets = [5, 0], sizes = [1, 128], strides = [1, 1]} : vector<12x384xf32> to vector<1x128xf32>
    %36 = vector.extract_strided_slice %25 {offsets = [6, 0], sizes = [1, 128], strides = [1, 1]} : vector<12x384xf32> to vector<1x128xf32>
    %37 = vector.extract_strided_slice %25 {offsets = [7, 0], sizes = [1, 128], strides = [1, 1]} : vector<12x384xf32> to vector<1x128xf32>
    %38 = vector.extract_strided_slice %25 {offsets = [8, 0], sizes = [1, 256], strides = [1, 1]} : vector<12x384xf32> to vector<1x256xf32>
    %39 = vector.extract_strided_slice %25 {offsets = [9, 0], sizes = [1, 128], strides = [1, 1]} : vector<12x384xf32> to vector<1x128xf32>
    %40 = vector.extract_strided_slice %25 {offsets = [10, 0], sizes = [1, 128], strides = [1, 1]} : vector<12x384xf32> to vector<1x128xf32>
    %41 = vector.extract_strided_slice %25 {offsets = [11, 0], sizes = [1, 128], strides = [1, 1]} : vector<12x384xf32> to vector<1x128xf32>
    %cst_24 = arith.constant dense<0.000000e+00> : vector<8x384xf32>
    %42 = tpu.matmul %1, %26, %cst_24 {dimension_numbers = #tpu.dot_dimension_numbers<[1], [0], [0], [1], [0, 0, 1, 1], [], []>} : vector<8x128xf32>, vector<128x384xf32>, vector<8x384xf32> -> vector<8x384xf32>
    %43 = vector.broadcast %30 : vector<1x384xf32> to vector<8x384xf32>
    %44 = arith.addf %42, %43 : vector<8x384xf32>
    %45 = vector.extract_strided_slice %44 {offsets = [0, 0], sizes = [8, 128], strides = [1, 1]} : vector<8x384xf32> to vector<8x128xf32>
    %46 = vector.extract_strided_slice %44 {offsets = [0, 128], sizes = [8, 128], strides = [1, 1]} : vector<8x384xf32> to vector<8x128xf32>
    %47 = vector.extract_strided_slice %44 {offsets = [0, 256], sizes = [8, 128], strides = [1, 1]} : vector<8x384xf32> to vector<8x128xf32>
    %48 = vector.extract_strided_slice %45 {offsets = [0, 0], sizes = [8, 32], strides = [1, 1]} : vector<8x128xf32> to vector<8x32xf32>
    %49 = vector.extract_strided_slice %45 {offsets = [0, 32], sizes = [8, 32], strides = [1, 1]} : vector<8x128xf32> to vector<8x32xf32>
    %50 = vector.extract_strided_slice %45 {offsets = [0, 64], sizes = [8, 32], strides = [1, 1]} : vector<8x128xf32> to vector<8x32xf32>
    %51 = vector.extract_strided_slice %45 {offsets = [0, 96], sizes = [8, 32], strides = [1, 1]} : vector<8x128xf32> to vector<8x32xf32>
    %52 = vector.shape_cast %48 : vector<8x32xf32> to vector<1x8x32xf32>
    %53 = vector.shape_cast %49 : vector<8x32xf32> to vector<1x8x32xf32>
    %54 = vector.shape_cast %50 : vector<8x32xf32> to vector<1x8x32xf32>
    %55 = vector.shape_cast %51 : vector<8x32xf32> to vector<1x8x32xf32>
    %56 = tpu.concatenate %52, %53, %54, %55 in 0 : vector<1x8x32xf32>, vector<1x8x32xf32>, vector<1x8x32xf32>, vector<1x8x32xf32> -> vector<4x8x32xf32>
    %57 = vector.extract_strided_slice %46 {offsets = [0, 0], sizes = [8, 32], strides = [1, 1]} : vector<8x128xf32> to vector<8x32xf32>
    %58 = vector.extract_strided_slice %46 {offsets = [0, 32], sizes = [8, 32], strides = [1, 1]} : vector<8x128xf32> to vector<8x32xf32>
    %59 = vector.extract_strided_slice %46 {offsets = [0, 64], sizes = [8, 32], strides = [1, 1]} : vector<8x128xf32> to vector<8x32xf32>
    %60 = vector.extract_strided_slice %46 {offsets = [0, 96], sizes = [8, 32], strides = [1, 1]} : vector<8x128xf32> to vector<8x32xf32>
    %61 = vector.shape_cast %57 : vector<8x32xf32> to vector<1x8x32xf32>
    %62 = vector.shape_cast %58 : vector<8x32xf32> to vector<1x8x32xf32>
    %63 = vector.shape_cast %59 : vector<8x32xf32> to vector<1x8x32xf32>
    %64 = vector.shape_cast %60 : vector<8x32xf32> to vector<1x8x32xf32>
    %65 = tpu.concatenate %61, %62, %63, %64 in 0 : vector<1x8x32xf32>, vector<1x8x32xf32>, vector<1x8x32xf32>, vector<1x8x32xf32> -> vector<4x8x32xf32>
    %66 = vector.extract_strided_slice %47 {offsets = [0, 0], sizes = [8, 32], strides = [1, 1]} : vector<8x128xf32> to vector<8x32xf32>
    %67 = vector.extract_strided_slice %47 {offsets = [0, 32], sizes = [8, 32], strides = [1, 1]} : vector<8x128xf32> to vector<8x32xf32>
    %68 = vector.extract_strided_slice %47 {offsets = [0, 64], sizes = [8, 32], strides = [1, 1]} : vector<8x128xf32> to vector<8x32xf32>
    %69 = vector.extract_strided_slice %47 {offsets = [0, 96], sizes = [8, 32], strides = [1, 1]} : vector<8x128xf32> to vector<8x32xf32>
    %70 = vector.shape_cast %66 : vector<8x32xf32> to vector<1x8x32xf32>
    %71 = vector.shape_cast %67 : vector<8x32xf32> to vector<1x8x32xf32>
    %72 = vector.shape_cast %68 : vector<8x32xf32> to vector<1x8x32xf32>
    %73 = vector.shape_cast %69 : vector<8x32xf32> to vector<1x8x32xf32>
    %74 = tpu.concatenate %70, %71, %72, %73 in 0 : vector<1x8x32xf32>, vector<1x8x32xf32>, vector<1x8x32xf32>, vector<1x8x32xf32> -> vector<4x8x32xf32>
    "tpu.trace_start"() <{level = 10 : i32, message = "hqd,hkd->hqk"}> : () -> ()
    %cst_25 = arith.constant dense<0.000000e+00> : vector<4x8x8xf32>
    %75 = tpu.matmul %56, %65, %cst_25 {dimension_numbers = #tpu.dot_dimension_numbers<[2], [2], [1], [1], [0, 0, 0, 1, 1, 1], [0], [0]>} : vector<4x8x32xf32>, vector<4x8x32xf32>, vector<4x8x8xf32> -> vector<4x8x8xf32>
    "tpu.trace_stop"() : () -> ()
    %76 = vector.shape_cast %18 : vector<8x8xf32> to vector<1x8x8xf32>
    %77 = vector.broadcast %76 : vector<1x8x8xf32> to vector<4x8x8xf32>
    %78 = arith.addf %75, %77 : vector<4x8x8xf32>
    %cst_26 = arith.constant dense<0xFF800000> : vector<4x8xf32>
    %79 = vector.multi_reduction <maximumf>, %78, %cst_26 [2] : vector<4x8x8xf32> to vector<4x8xf32>
    %80 = vector.shape_cast %79 : vector<4x8xf32> to vector<4x8x1xf32>
    %81 = vector.broadcast %80 : vector<4x8x1xf32> to vector<4x8x8xf32>
    %82 = arith.subf %78, %81 : vector<4x8x8xf32>
    %83 = math.exp %82 : vector<4x8x8xf32>
    %cst_27 = arith.constant dense<0.000000e+00> : vector<4x8xf32>
    %84 = vector.multi_reduction <add>, %83, %cst_27 [2] : vector<4x8x8xf32> to vector<4x8xf32>
    %85 = vector.shape_cast %84 : vector<4x8xf32> to vector<4x8x1xf32>
    %86 = tpu.reciprocal %85 {approx = true} : vector<4x8x1xf32> -> vector<4x8x1xf32>
    %87 = vector.broadcast %86 : vector<4x8x1xf32> to vector<4x8x8xf32>
    %88 = arith.mulf %83, %87 : vector<4x8x8xf32>
    "tpu.trace_start"() <{level = 10 : i32, message = "hqk,hkd->hqd"}> : () -> ()
    %cst_28 = arith.constant dense<0.000000e+00> : vector<4x8x32xf32>
    %89 = tpu.matmul %88, %74, %cst_28 {dimension_numbers = #tpu.dot_dimension_numbers<[2], [1], [1], [2], [0, 0, 0, 1, 1, 2], [0], [0]>} : vector<4x8x8xf32>, vector<4x8x32xf32>, vector<4x8x32xf32> -> vector<4x8x32xf32>
    "tpu.trace_stop"() : () -> ()
    %90 = vector.extract_strided_slice %89 {offsets = [0, 0, 0], sizes = [1, 8, 32], strides = [1, 1, 1]} : vector<4x8x32xf32> to vector<1x8x32xf32>
    %91 = vector.shape_cast %90 : vector<1x8x32xf32> to vector<8x32xf32>
    %92 = vector.extract_strided_slice %89 {offsets = [1, 0, 0], sizes = [1, 8, 32], strides = [1, 1, 1]} : vector<4x8x32xf32> to vector<1x8x32xf32>
    %93 = vector.shape_cast %92 : vector<1x8x32xf32> to vector<8x32xf32>
    %94 = vector.extract_strided_slice %89 {offsets = [2, 0, 0], sizes = [1, 8, 32], strides = [1, 1, 1]} : vector<4x8x32xf32> to vector<1x8x32xf32>
    %95 = vector.shape_cast %94 : vector<1x8x32xf32> to vector<8x32xf32>
    %96 = vector.extract_strided_slice %89 {offsets = [3, 0, 0], sizes = [1, 8, 32], strides = [1, 1, 1]} : vector<4x8x32xf32> to vector<1x8x32xf32>
    %97 = vector.shape_cast %96 : vector<1x8x32xf32> to vector<8x32xf32>
    %98 = tpu.concatenate %91, %93, %95, %97 in 1 : vector<8x32xf32>, vector<8x32xf32>, vector<8x32xf32>, vector<8x32xf32> -> vector<8x128xf32>
    %cst_29 = arith.constant dense<0.000000e+00> : vector<8x128xf32>
    %99 = tpu.matmul %98, %28, %cst_29 {dimension_numbers = #tpu.dot_dimension_numbers<[1], [0], [0], [1], [0, 0, 1, 1], [], []>} : vector<8x128xf32>, vector<128x128xf32>, vector<8x128xf32> -> vector<8x128xf32>
    %100 = vector.broadcast %31 : vector<1x128xf32> to vector<8x128xf32>
    %101 = arith.addf %99, %100 : vector<8x128xf32>
    %102 = arith.addf %1, %101 : vector<8x128xf32>
    %cst_30 = arith.constant dense<0.000000e+00> : vector<8xf32>
    %103 = vector.multi_reduction <add>, %102, %cst_30 [1] : vector<8x128xf32> to vector<8xf32>
    %104 = vector.shape_cast %103 : vector<8xf32> to vector<8x1xf32>
    %cst_31 = arith.constant 1.280000e+02 : f32
    %105 = vector.broadcast %cst_31 : f32 to vector<8x1xf32>
    %106 = arith.divf %104, %105 : vector<8x1xf32>
    %107 = vector.broadcast %106 : vector<8x1xf32> to vector<8x128xf32>
    %108 = arith.subf %102, %107 : vector<8x128xf32>
    %109 = arith.mulf %108, %108 : vector<8x128xf32>
    %cst_32 = arith.constant dense<0.000000e+00> : vector<8xf32>
    %110 = vector.multi_reduction <add>, %109, %cst_32 [1] : vector<8x128xf32> to vector<8xf32>
    %111 = vector.shape_cast %110 : vector<8xf32> to vector<8x1xf32>
    %cst_33 = arith.constant 1.280000e+02 : f32
    %112 = vector.broadcast %cst_33 : f32 to vector<8x1xf32>
    %113 = arith.divf %111, %112 : vector<8x1xf32>
    %114 = vector.broadcast %106 : vector<8x1xf32> to vector<8x128xf32>
    %115 = arith.subf %102, %114 : vector<8x128xf32>
    %cst_34 = arith.constant 9.99999974E-6 : f32
    %116 = vector.broadcast %cst_34 : f32 to vector<8x1xf32>
    %117 = arith.addf %113, %116 : vector<8x1xf32>
    %118 = math.rsqrt %117 : vector<8x1xf32>
    %119 = vector.broadcast %118 : vector<8x1xf32> to vector<8x128xf32>
    %120 = arith.mulf %115, %119 : vector<8x128xf32>
    %121 = vector.broadcast %32 : vector<1x128xf32> to vector<8x128xf32>
    %122 = arith.mulf %120, %121 : vector<8x128xf32>
    %123 = vector.broadcast %33 : vector<1x128xf32> to vector<8x128xf32>
    %124 = arith.addf %122, %123 : vector<8x128xf32>
    %125 = arith.mulf %124, %7 : vector<8x128xf32>
    %126 = vector.extract_strided_slice %27 {offsets = [0, 0], sizes = [128, 128], strides = [1, 1]} : vector<128x384xf32> to vector<128x128xf32>
    %cst_35 = arith.constant dense<0.000000e+00> : vector<8x128xf32>
    %127 = tpu.matmul %125, %126, %cst_35 {dimension_numbers = #tpu.dot_dimension_numbers<[1], [0], [0], [1], [0, 0, 1, 1], [], []>} : vector<8x128xf32>, vector<128x128xf32>, vector<8x128xf32> -> vector<8x128xf32>
    %128 = vector.extract_strided_slice %34 {offsets = [0, 0], sizes = [1, 128], strides = [1, 1]} : vector<1x384xf32> to vector<1x128xf32>
    %129 = vector.broadcast %128 : vector<1x128xf32> to vector<8x128xf32>
    %130 = arith.addf %127, %129 : vector<8x128xf32>
    %131 = vector.extract_strided_slice %27 {offsets = [0, 128], sizes = [128, 256], strides = [1, 1]} : vector<128x384xf32> to vector<128x256xf32>
    %cst_36 = arith.constant dense<0.000000e+00> : vector<16x256xf32>
    %132 = tpu.matmul %3, %131, %cst_36 {dimension_numbers = #tpu.dot_dimension_numbers<[1], [0], [0], [1], [0, 0, 1, 1], [], []>} : vector<16x128xf32>, vector<128x256xf32>, vector<16x256xf32> -> vector<16x256xf32>
    %133 = vector.extract_strided_slice %34 {offsets = [0, 128], sizes = [1, 256], strides = [1, 1]} : vector<1x384xf32> to vector<1x256xf32>
    %134 = vector.broadcast %133 : vector<1x256xf32> to vector<16x256xf32>
    %135 = arith.addf %132, %134 : vector<16x256xf32>
    %136 = vector.extract_strided_slice %135 {offsets = [0, 0], sizes = [16, 128], strides = [1, 1]} : vector<16x256xf32> to vector<16x128xf32>
    %137 = vector.extract_strided_slice %135 {offsets = [0, 128], sizes = [16, 128], strides = [1, 1]} : vector<16x256xf32> to vector<16x128xf32>
    %138 = vector.extract_strided_slice %130 {offsets = [0, 0], sizes = [8, 32], strides = [1, 1]} : vector<8x128xf32> to vector<8x32xf32>
    %139 = vector.extract_strided_slice %130 {offsets = [0, 32], sizes = [8, 32], strides = [1, 1]} : vector<8x128xf32> to vector<8x32xf32>
    %140 = vector.extract_strided_slice %130 {offsets = [0, 64], sizes = [8, 32], strides = [1, 1]} : vector<8x128xf32> to vector<8x32xf32>
    %141 = vector.extract_strided_slice %130 {offsets = [0, 96], sizes = [8, 32], strides = [1, 1]} : vector<8x128xf32> to vector<8x32xf32>
    %142 = vector.shape_cast %138 : vector<8x32xf32> to vector<1x8x32xf32>
    %143 = vector.shape_cast %139 : vector<8x32xf32> to vector<1x8x32xf32>
    %144 = vector.shape_cast %140 : vector<8x32xf32> to vector<1x8x32xf32>
    %145 = vector.shape_cast %141 : vector<8x32xf32> to vector<1x8x32xf32>
    %146 = tpu.concatenate %142, %143, %144, %145 in 0 : vector<1x8x32xf32>, vector<1x8x32xf32>, vector<1x8x32xf32>, vector<1x8x32xf32> -> vector<4x8x32xf32>
    %147 = vector.extract_strided_slice %136 {offsets = [0, 0], sizes = [16, 32], strides = [1, 1]} : vector<16x128xf32> to vector<16x32xf32>
    %148 = vector.extract_strided_slice %136 {offsets = [0, 32], sizes = [16, 32], strides = [1, 1]} : vector<16x128xf32> to vector<16x32xf32>
    %149 = vector.extract_strided_slice %136 {offsets = [0, 64], sizes = [16, 32], strides = [1, 1]} : vector<16x128xf32> to vector<16x32xf32>
    %150 = vector.extract_strided_slice %136 {offsets = [0, 96], sizes = [16, 32], strides = [1, 1]} : vector<16x128xf32> to vector<16x32xf32>
    %151 = vector.shape_cast %147 : vector<16x32xf32> to vector<1x16x32xf32>
    %152 = vector.shape_cast %148 : vector<16x32xf32> to vector<1x16x32xf32>
    %153 = vector.shape_cast %149 : vector<16x32xf32> to vector<1x16x32xf32>
    %154 = vector.shape_cast %150 : vector<16x32xf32> to vector<1x16x32xf32>
    %155 = tpu.concatenate %151, %152, %153, %154 in 0 : vector<1x16x32xf32>, vector<1x16x32xf32>, vector<1x16x32xf32>, vector<1x16x32xf32> -> vector<4x16x32xf32>
    %156 = vector.extract_strided_slice %137 {offsets = [0, 0], sizes = [16, 32], strides = [1, 1]} : vector<16x128xf32> to vector<16x32xf32>
    %157 = vector.extract_strided_slice %137 {offsets = [0, 32], sizes = [16, 32], strides = [1, 1]} : vector<16x128xf32> to vector<16x32xf32>
    %158 = vector.extract_strided_slice %137 {offsets = [0, 64], sizes = [16, 32], strides = [1, 1]} : vector<16x128xf32> to vector<16x32xf32>
    %159 = vector.extract_strided_slice %137 {offsets = [0, 96], sizes = [16, 32], strides = [1, 1]} : vector<16x128xf32> to vector<16x32xf32>
    %160 = vector.shape_cast %156 : vector<16x32xf32> to vector<1x16x32xf32>
    %161 = vector.shape_cast %157 : vector<16x32xf32> to vector<1x16x32xf32>
    %162 = vector.shape_cast %158 : vector<16x32xf32> to vector<1x16x32xf32>
    %163 = vector.shape_cast %159 : vector<16x32xf32> to vector<1x16x32xf32>
    %164 = tpu.concatenate %160, %161, %162, %163 in 0 : vector<1x16x32xf32>, vector<1x16x32xf32>, vector<1x16x32xf32>, vector<1x16x32xf32> -> vector<4x16x32xf32>
    "tpu.trace_start"() <{level = 10 : i32, message = "hqd,hkd->hqk"}> : () -> ()
    %cst_37 = arith.constant dense<0.000000e+00> : vector<4x8x16xf32>
    %165 = tpu.matmul %146, %155, %cst_37 {dimension_numbers = #tpu.dot_dimension_numbers<[2], [2], [1], [1], [0, 0, 0, 1, 1, 1], [0], [0]>} : vector<4x8x32xf32>, vector<4x16x32xf32>, vector<4x8x16xf32> -> vector<4x8x16xf32>
    "tpu.trace_stop"() : () -> ()
    %166 = vector.shape_cast %20 : vector<1x16xf32> to vector<1x1x16xf32>
    %167 = vector.broadcast %166 : vector<1x1x16xf32> to vector<4x8x16xf32>
    %168 = arith.addf %165, %167 : vector<4x8x16xf32>
    %cst_38 = arith.constant dense<0xFF800000> : vector<4x8xf32>
    %169 = vector.multi_reduction <maximumf>, %168, %cst_38 [2] : vector<4x8x16xf32> to vector<4x8xf32>
    %170 = vector.shape_cast %169 : vector<4x8xf32> to vector<4x8x1xf32>
    %171 = vector.broadcast %170 : vector<4x8x1xf32> to vector<4x8x16xf32>
    %172 = arith.subf %168, %171 : vector<4x8x16xf32>
    %173 = math.exp %172 : vector<4x8x16xf32>
    %cst_39 = arith.constant dense<0.000000e+00> : vector<4x8xf32>
    %174 = vector.multi_reduction <add>, %173, %cst_39 [2] : vector<4x8x16xf32> to vector<4x8xf32>
    %175 = vector.shape_cast %174 : vector<4x8xf32> to vector<4x8x1xf32>
    %176 = tpu.reciprocal %175 {approx = true} : vector<4x8x1xf32> -> vector<4x8x1xf32>
    %177 = vector.broadcast %176 : vector<4x8x1xf32> to vector<4x8x16xf32>
    %178 = arith.mulf %173, %177 : vector<4x8x16xf32>
    "tpu.trace_start"() <{level = 10 : i32, message = "hqk,hkd->hqd"}> : () -> ()
    %cst_40 = arith.constant dense<0.000000e+00> : vector<4x8x32xf32>
    %179 = tpu.matmul %178, %164, %cst_40 {dimension_numbers = #tpu.dot_dimension_numbers<[2], [1], [1], [2], [0, 0, 0, 1, 1, 2], [0], [0]>} : vector<4x8x16xf32>, vector<4x16x32xf32>, vector<4x8x32xf32> -> vector<4x8x32xf32>
    "tpu.trace_stop"() : () -> ()
    %180 = vector.extract_strided_slice %179 {offsets = [0, 0, 0], sizes = [1, 8, 32], strides = [1, 1, 1]} : vector<4x8x32xf32> to vector<1x8x32xf32>
    %181 = vector.shape_cast %180 : vector<1x8x32xf32> to vector<8x32xf32>
    %182 = vector.extract_strided_slice %179 {offsets = [1, 0, 0], sizes = [1, 8, 32], strides = [1, 1, 1]} : vector<4x8x32xf32> to vector<1x8x32xf32>
    %183 = vector.shape_cast %182 : vector<1x8x32xf32> to vector<8x32xf32>
    %184 = vector.extract_strided_slice %179 {offsets = [2, 0, 0], sizes = [1, 8, 32], strides = [1, 1, 1]} : vector<4x8x32xf32> to vector<1x8x32xf32>
    %185 = vector.shape_cast %184 : vector<1x8x32xf32> to vector<8x32xf32>
    %186 = vector.extract_strided_slice %179 {offsets = [3, 0, 0], sizes = [1, 8, 32], strides = [1, 1, 1]} : vector<4x8x32xf32> to vector<1x8x32xf32>
    %187 = vector.shape_cast %186 : vector<1x8x32xf32> to vector<8x32xf32>
    %188 = tpu.concatenate %181, %183, %185, %187 in 1 : vector<8x32xf32>, vector<8x32xf32>, vector<8x32xf32>, vector<8x32xf32> -> vector<8x128xf32>
    %cst_41 = arith.constant dense<0.000000e+00> : vector<8x128xf32>
    %189 = tpu.matmul %188, %29, %cst_41 {dimension_numbers = #tpu.dot_dimension_numbers<[1], [0], [0], [1], [0, 0, 1, 1], [], []>} : vector<8x128xf32>, vector<128x128xf32>, vector<8x128xf32> -> vector<8x128xf32>
    %190 = vector.broadcast %35 : vector<1x128xf32> to vector<8x128xf32>
    %191 = arith.addf %189, %190 : vector<8x128xf32>
    %192 = arith.addf %125, %191 : vector<8x128xf32>
    %cst_42 = arith.constant dense<0.000000e+00> : vector<8xf32>
    %193 = vector.multi_reduction <add>, %192, %cst_42 [1] : vector<8x128xf32> to vector<8xf32>
    %194 = vector.shape_cast %193 : vector<8xf32> to vector<8x1xf32>
    %cst_43 = arith.constant 1.280000e+02 : f32
    %195 = vector.broadcast %cst_43 : f32 to vector<8x1xf32>
    %196 = arith.divf %194, %195 : vector<8x1xf32>
    %197 = vector.broadcast %196 : vector<8x1xf32> to vector<8x128xf32>
    %198 = arith.subf %192, %197 : vector<8x128xf32>
    %199 = arith.mulf %198, %198 : vector<8x128xf32>
    %cst_44 = arith.constant dense<0.000000e+00> : vector<8xf32>
    %200 = vector.multi_reduction <add>, %199, %cst_44 [1] : vector<8x128xf32> to vector<8xf32>
    %201 = vector.shape_cast %200 : vector<8xf32> to vector<8x1xf32>
    %cst_45 = arith.constant 1.280000e+02 : f32
    %202 = vector.broadcast %cst_45 : f32 to vector<8x1xf32>
    %203 = arith.divf %201, %202 : vector<8x1xf32>
    %204 = vector.broadcast %196 : vector<8x1xf32> to vector<8x128xf32>
    %205 = arith.subf %192, %204 : vector<8x128xf32>
    %cst_46 = arith.constant 9.99999974E-6 : f32
    %206 = vector.broadcast %cst_46 : f32 to vector<8x1xf32>
    %207 = arith.addf %203, %206 : vector<8x1xf32>
    %208 = math.rsqrt %207 : vector<8x1xf32>
    %209 = vector.broadcast %208 : vector<8x1xf32> to vector<8x128xf32>
    %210 = arith.mulf %205, %209 : vector<8x128xf32>
    %211 = vector.broadcast %36 : vector<1x128xf32> to vector<8x128xf32>
    %212 = arith.mulf %210, %211 : vector<8x128xf32>
    %213 = vector.broadcast %37 : vector<1x128xf32> to vector<8x128xf32>
    %214 = arith.addf %212, %213 : vector<8x128xf32>
    %215 = arith.mulf %214, %7 : vector<8x128xf32>
    %cst_47 = arith.constant dense<0.000000e+00> : vector<8x256xf32>
    %216 = tpu.matmul %215, %23, %cst_47 {dimension_numbers = #tpu.dot_dimension_numbers<[1], [0], [0], [1], [0, 0, 1, 1], [], []>} : vector<8x128xf32>, vector<128x256xf32>, vector<8x256xf32> -> vector<8x256xf32>
    %217 = vector.broadcast %38 : vector<1x256xf32> to vector<8x256xf32>
    %218 = arith.addf %216, %217 : vector<8x256xf32>
    %cst_48 = arith.constant 0.000000e+00 : f32
    %219 = vector.broadcast %cst_48 : f32 to vector<8x256xf32>
    %220 = arith.maximumf %218, %219 : vector<8x256xf32>
    %cst_49 = arith.constant dense<0.000000e+00> : vector<8x128xf32>
    %221 = tpu.matmul %220, %24, %cst_49 {dimension_numbers = #tpu.dot_dimension_numbers<[1], [0], [0], [1], [0, 0, 1, 1], [], []>} : vector<8x256xf32>, vector<256x128xf32>, vector<8x128xf32> -> vector<8x128xf32>
    %222 = vector.broadcast %39 : vector<1x128xf32> to vector<8x128xf32>
    %223 = arith.addf %221, %222 : vector<8x128xf32>
    %224 = arith.addf %215, %223 : vector<8x128xf32>
    %cst_50 = arith.constant dense<0.000000e+00> : vector<8xf32>
    %225 = vector.multi_reduction <add>, %224, %cst_50 [1] : vector<8x128xf32> to vector<8xf32>
    %226 = vector.shape_cast %225 : vector<8xf32> to vector<8x1xf32>
    %cst_51 = arith.constant 1.280000e+02 : f32
    %227 = vector.broadcast %cst_51 : f32 to vector<8x1xf32>
    %228 = arith.divf %226, %227 : vector<8x1xf32>
    %229 = vector.broadcast %228 : vector<8x1xf32> to vector<8x128xf32>
    %230 = arith.subf %224, %229 : vector<8x128xf32>
    %231 = arith.mulf %230, %230 : vector<8x128xf32>
    %cst_52 = arith.constant dense<0.000000e+00> : vector<8xf32>
    %232 = vector.multi_reduction <add>, %231, %cst_52 [1] : vector<8x128xf32> to vector<8xf32>
    %233 = vector.shape_cast %232 : vector<8xf32> to vector<8x1xf32>
    %cst_53 = arith.constant 1.280000e+02 : f32
    %234 = vector.broadcast %cst_53 : f32 to vector<8x1xf32>
    %235 = arith.divf %233, %234 : vector<8x1xf32>
    %236 = vector.broadcast %228 : vector<8x1xf32> to vector<8x128xf32>
    %237 = arith.subf %224, %236 : vector<8x128xf32>
    %cst_54 = arith.constant 9.99999974E-6 : f32
    %238 = vector.broadcast %cst_54 : f32 to vector<8x1xf32>
    %239 = arith.addf %235, %238 : vector<8x1xf32>
    %240 = math.rsqrt %239 : vector<8x1xf32>
    %241 = vector.broadcast %240 : vector<8x1xf32> to vector<8x128xf32>
    %242 = arith.mulf %237, %241 : vector<8x128xf32>
    %243 = vector.broadcast %40 : vector<1x128xf32> to vector<8x128xf32>
    %244 = arith.mulf %242, %243 : vector<8x128xf32>
    %245 = vector.broadcast %41 : vector<1x128xf32> to vector<8x128xf32>
    %246 = arith.addf %244, %245 : vector<8x128xf32>
    %247 = arith.mulf %246, %7 : vector<8x128xf32>
    %c0_55 = arith.constant 0 : index
    %c0_56 = arith.constant 0 : index
    %c0_57 = arith.constant 0 : index
    %248 = vector.load %arg11[%c0_55, %c0_56, %c0_57] : memref<1x8x128xf32, #tpu.memory_space<vmem>>, vector<1x8x128xf32>
    %249 = vector.shape_cast %248 : vector<1x8x128xf32> to vector<8x128xf32>
    %250 = vector.shape_cast %247 : vector<8x128xf32> to vector<1x8x128xf32>
    tpu.vector_store %arg11[%c0_55, %c0_56, %c0_57], %250 {strides = array<i32>} : memref<1x8x128xf32, #tpu.memory_space<vmem>>, vector<1x8x128xf32>,
    return
  }
  func.func @transform_0(%arg0: i32) -> (i32, i32, i32) {
    %c0_i32 = arith.constant 0 : i32
    %c0_i32_0 = arith.constant 0 : i32
    %c0_i32_1 = arith.constant 0 : i32
    return %arg0, %c0_i32, %c0_i32_0 : i32, i32, i32
  }
  func.func @transform_1(%arg0: i32) -> (i32, i32, i32) {
    %c0_i32 = arith.constant 0 : i32
    %c0_i32_0 = arith.constant 0 : i32
    %c0_i32_1 = arith.constant 0 : i32
    return %arg0, %c0_i32, %c0_i32_0 : i32, i32, i32
  }
  func.func @transform_2(%arg0: i32) -> (i32, i32, i32) {
    %c0_i32 = arith.constant 0 : i32
    %c0_i32_0 = arith.constant 0 : i32
    %c0_i32_1 = arith.constant 0 : i32
    return %arg0, %c0_i32, %c0_i32_0 : i32, i32, i32
  }
  func.func @transform_3(%arg0: i32) -> (i32, i32, i32) {
    %c0_i32 = arith.constant 0 : i32
    %c0_i32_0 = arith.constant 0 : i32
    %c0_i32_1 = arith.constant 0 : i32
    return %arg0, %c0_i32, %c0_i32_0 : i32, i32, i32
  }
  func.func @transform_4(%arg0: i32) -> (i32, i32, i32) {
    %c0_i32 = arith.constant 0 : i32
    %c0_i32_0 = arith.constant 0 : i32
    %c0_i32_1 = arith.constant 0 : i32
    return %arg0, %c0_i32, %c0_i32_0 : i32, i32, i32
  }
  func.func @transform_5(%arg0: i32) -> (i32, i32) {
    %c0_i32 = arith.constant 0 : i32
    %c0_i32_0 = arith.constant 0 : i32
    %c0_i32_1 = arith.constant 0 : i32
    return %c0_i32, %c0_i32_0 : i32, i32
  }
  func.func @transform_6(%arg0: i32) -> (i32, i32) {
    %c0_i32 = arith.constant 0 : i32
    %c0_i32_0 = arith.constant 0 : i32
    %c0_i32_1 = arith.constant 0 : i32
    return %c0_i32, %c0_i32_0 : i32, i32
  }
  func.func @transform_7(%arg0: i32) -> (i32, i32) {
    %c0_i32 = arith.constant 0 : i32
    %c0_i32_0 = arith.constant 0 : i32
    %c0_i32_1 = arith.constant 0 : i32
    return %c0_i32, %c0_i32_0 : i32, i32
  }
  func.func @transform_8(%arg0: i32) -> (i32, i32) {
    %c0_i32 = arith.constant 0 : i32
    %c0_i32_0 = arith.constant 0 : i32
    %c0_i32_1 = arith.constant 0 : i32
    return %c0_i32, %c0_i32_0 : i32, i32
  }
  func.func @transform_9(%arg0: i32) -> (i32, i32) {
    %c0_i32 = arith.constant 0 : i32
    %c0_i32_0 = arith.constant 0 : i32
    %c0_i32_1 = arith.constant 0 : i32
    return %c0_i32, %c0_i32_0 : i32, i32
  }
  func.func @transform_10(%arg0: i32) -> (i32, i32, i32) {
    %c0_i32 = arith.constant 0 : i32
    %c0_i32_0 = arith.constant 0 : i32
    %c0_i32_1 = arith.constant 0 : i32
    return %arg0, %c0_i32, %c0_i32_0 : i32, i32, i32
  }
}

</mosaic_0001>

<bundles_post_ra>
// kernel: decoder_layer.1
= control target key start
LH: loop header
LB: loop body
LE: loop exit
PB: predicated region body
PF: predicated region fallthrough
CT: control target
= control target key end

     0   :  { %s2570_s0 = inlined_call_operand.vmem [shape: f32[2,8,128], index: 0, kind: input, shape index: {}]   ;;  %s2571_s1 = inlined_call_operand.vmem [shape: f32[2,16,128], index: 1, kind: input, shape index: {}]   ;;  %s2572_s2 = inlined_call_operand.vmem [shape: f32[2,8,1], index: 2, kind: input, shape index: {}]   ;;  %s2573_s3 = inlined_call_operand.vmem [shape: f32[2,1,8], index: 3, kind: input, shape index: {}]   ;;  %s2574_s4 = inlined_call_operand.vmem [shape: f32[2,1,16], index: 4, kind: input, shape index: {}]   ;;  %s2575_s5 = inlined_call_operand.hbm [shape: f32[256,384], index: 5, kind: input, shape index: {}]   ;;  %s2576_s6 = inlined_call_operand.hbm [shape: f32[256,128], index: 6, kind: input, shape index: {}]   ;;  %s2577_s7 = inlined_call_operand.hbm [shape: f32[128,256], index: 7, kind: input, shape index: {}]   ;;  %s2578_s8 = inlined_call_operand.hbm [shape: f32[256,128], index: 8, kind: input, shape index: {}]   ;;  %s2579_s9 = inlined_call_operand.vmem [shape: f32[12,384], index: 9, kind: input, shape index: {}]   ;;  %s2580_s10 = inlined_call_operand.hbm [shape: f32[2,8,128], index: 10, kind: output, shape index: {}]  }
   0x1   :  { %2589 = sst [smem:[#allocation22_spill]] %s2575_s5 }
   0x2   :  { %2590 = sst [smem:[#allocation23_spill]] %s2576_s6 }
   0x3   :  { %15 = vsyncpa [#allocation3], 0 }
   0x4   :  { %16 = vsyncpa [#allocation6], 0 }
   0x5   :  { %17 = vsyncpa [#allocation9], 0 }
   0x6   :  { %18 = vsyncpa [#allocation4], 0 }
   0x7   :  { %20 = vsyncpa [#allocation4 + $0x1], 0  ;;  %s2255_s13 = smov 0   ;;  %s2257_s14 = smov 0  }
   0x8   :  { %s2259_s15 = smov 0   ;;  %s2261_s16 = smov 0  }
   0x9 LB: > { %2591 = sst [smem:[#allocation15_spill]] %s2170_s13  ;;  %s2276_s17 = sadd.s32 4294967295, %s2182_s16   ;;  %s2182_s16 = sphi %s2261_s16, %s2608_s16   ;;  %s2178_s15 = sphi %s2259_s15, %s2610_s15   ;;  %s2174_s14 = sphi %s2257_s14, %s2612_s14   ;;  %s2170_s13 = sphi %s2255_s13, %s2611_s13  }
   0xa   : > { %2592 = sst [smem:[#allocation16_spill]] %s2178_s15  ;;  %s1785_s18 = sadd.s32 4294967294, %s2182_s16  }
   0xb   : > { %2593 = sst [smem:[#allocation17_spill]] %s2182_s16  ;;  %s2280_s19 = sadd.s32 1, %s2182_s16  }
   0xc   : > { %2594 = sst [smem:[#allocation18_spill]] %s2280_s19  ;;  %s268_s20 = sadd.s32 1, %s2178_s15 }
   0xd   : > { %s265_s21 = ssub.s32 %s2182_s16, %s2280_s19  ;;  %p278_p0 = scmp.ne.s32.totalorder %s2178_s15, %s2174_s14 }
   0xe   : > { %p266_p1 = scmp.eq.s32.totalorder %s265_s21, 0  ;;  %p279_p2 = scmp.eq.s32.totalorder %s2276_s17, 1 }
   0xf   : > { %p284_p3 = scmp.ne.s32.totalorder %s2174_s14, %s2170_s13  ;;  %p285_p4 = scmp.eq.s32.totalorder %s1785_s18, 1 }
  0x10   : > { %s2291_s22 = scalar_select %p266_p1, %s2178_s15, %s268_s20  }
  0x11   : > { %p2293_p5 = por %p279_p2, %p278_p0  ;;  %p2297_p6 = por %p285_p4, %p284_p3 }
  0x12   : > { %2595 = sst [smem:[#allocation19_spill]] %s2291_s22  ;;  %p1786_p7 = scmp.ge.s32.totalorder %s2182_s16, 1 }
  0x13   : > { %s2596_s23 = scalar_select %p2293_p5, 1, 0 }
  0x14   : > { %s2598_s24 = scalar_select %p2297_p6, 1, 0 }
  0x15   : > { %2597 = sst [smem:[#allocation20_spill]] %s2596_s23  ;;  %p292_p8 = scmp.lt.s32.totalorder %s2182_s16, 3 }
  0x16   : > { %2599 = sst [smem:[#allocation21_spill]] %s2598_s24  ;;  %p1871_p9 = scmp.eq.s32.totalorder %s2276_s17, 0 }
  0x17   : > { %p2304_p10 = pnand %p1786_p7, %p292_p8  ;;  %s2601_s6 = sld [smem:[#allocation23_spill]] }
  0x18   : > { %s2184_s29 = smov [#allocation5]   ;;  %s2603_s5 = sld [smem:[#allocation22_spill]] }
  0x19   : > { %p1854_p11 = pneg %p2304_p10  ;;  %s319_s30 = sshll.u32 %s2184_s29, 4  ;;  %s320_s30 = int_to_ptr.vmem [resolvable:$true] %s319_s30 }
  0x1a   : > { %s2185_s21 = smov 128   ;;  %s2186_s26 = smov 8  }
  0x1b   : > { %p2315_p12 = pnand %p1871_p9, %p1854_p11  ;;  %s2187_s27 = smov [#allocation2]  }
  0x1c   : > { %s305_s29 = sshll.u32 %s2187_s27, 4  ;;  %s2189_s22 = smov 24   ;;  %s306_s29 = int_to_ptr.vmem [resolvable:$true] %s305_s29 }
  0x1d   : > { %s317_s28 = sshll.u32 %s2601_s6, 4  ;;  %s2188_s6 = smov 384   ;;  %s318_s28 = int_to_ptr.hbm [resolvable:$true] %s317_s28 }
  0x1e   : > { %s303_s20 = sshll.u32 %s2603_s5, 4  ;;  %s331_s12 = sshll.u32 %s2577_s7, 4  ;;  %s304_s20 = int_to_ptr.hbm [resolvable:$true] %s303_s20  ;;  %s332_s12 = int_to_ptr.hbm [resolvable:$true] %s331_s12 }
  0x1f   : > { %1860 = dma.hbm_to_vmem [thread:$0]  (!%p2315_p12), %s318_s28, 4096, %s320_s30, [#allocation6], %s2185_s21, %s2185_s21, %s2186_s26  }
  0x20   : > { %1857 = dma.hbm_to_vmem [thread:$0]  (!%p2315_p12), %s304_s20, 12288, %s306_s29, [#allocation3], %s2188_s6, %s2188_s6, %s2189_s22  }
  0x21   : > { %s2190_s18 = smov [#allocation7]   ;;  %s345_s28 = sshll.u32 %s2578_s8, 4  ;;  %s346_s28 = int_to_ptr.hbm [resolvable:$true] %s345_s28 }
  0x22   : > { %s333_s5 = sshll.u32 %s2190_s18, 4  ;;  %s2191_s30 = smov 256   ;;  %s334_s5 = int_to_ptr.vmem [resolvable:$true] %s333_s5 }
  0x23   : > { %s2192_s27 = smov 16   ;;  %s2193_s16 = smov [#allocation8]  }
  0x24   : > { %1863 = dma.hbm_to_vmem [thread:$0]  (!%p2315_p12), %s332_s12, 4096, %s334_s5, [#allocation6], %s2191_s30, %s2191_s30, %s2192_s27  }
  0x25   : > { %s347_s23 = sshll.u32 %s2193_s16, 4  ;;  %400 = sbr.rel (%p2304_p10) target bundleno = 3229 (0xc9d), region = 60  ;;  %s348_s23 = int_to_ptr.vmem [resolvable:$true] %s347_s23 }
  0x26   : > { %1866 = dma.hbm_to_vmem [thread:$0]  (!%p2315_p12), %s346_s28, 4096, %s348_s23, [#allocation9], %s2185_s21, %s2185_s21, %s2186_s26  }
  0x2a   : > { %2153 = dma.done.wait (%p1871_p9), [#allocation3], 12288  }
  0x2b   : > { %2155 = vsyncadd (%p1871_p9), [#allocation3], 4294955008 }
  0x2c   : > { %2157 = dma.done.wait (%p1871_p9), [#allocation6], 8192  }
  0x2d   : > { %2159 = vsyncadd (%p1871_p9), [#allocation6], 4294959104 }
  0x2e   : > { %2161 = dma.done.wait (%p1871_p9), [#allocation9], 4096  }
  0x2f   : > { %2163 = vsyncadd (%p1871_p9), [#allocation9], 4294963200  ;;  %v556_v0 = vld [vmem:[#allocation2 + $0x170] sm:$0xff]  ;;  %v553_v1 = vld [vmem:[#allocation2 + $0x158] sm:$0xff]  ;;  %p468_p13 = scmp.lt.s32.totalorder %s2276_s17, 1  ;;  %vm794_vm0 = vcmask 261120   ;;  %v496_v46 = vlaneseq }
  0x30   : > { %v555_v2 = vld [vmem:[#allocation2 + $0x168] sm:$0xff]  ;;  %730 = vmatpush.msra.mxu1 %v556_v0  ;;  %v552_v3 = vld [vmem:[#allocation2 + $0x150] sm:$0xff]  ;;  %v550_v4 = vld [vmem:[#allocation2 + $0x140] sm:$0xff]  ;;  %s2194_s25 = smov 32   ;;  %s2195_s11 = smov 64   ;;  %v2197_v58 = vmov 0.0  }
  0x31   : > { %710 = vmatpush.msra.mxu0 %v555_v2  ;;  %v549_v5 = vld [vmem:[#allocation2 + $0x138] sm:$0xff]  ;;  %v547_v6 = vld [vmem:[#allocation2 + $0x128] sm:$0xff]  ;;  %v546_v7 = vld [vmem:[#allocation2 + $0x120] sm:$0xff]  ;;  %s2352_s5 = scalar_select %p468_p13, %s2276_s17, 1  ;;  %v497_v50 = vshrl.u32 %v496_v46, 7  ;;  %v499_v51 = vand.u32 127, %v496_v46 }
  0x32   : > { %731 = vmatpush.msra.mxu1 %v553_v1  ;;  %v544_v8 = vld [vmem:[#allocation2 + $0x110] sm:$0xff]  ;;  %v543_v9 = vld [vmem:[#allocation2 + $0x108] sm:$0xff]  ;;  %v541_v10 = vld [vmem:[#allocation2 + $0xf8] sm:$0xff]  ;;  %s2196_s20 = smov 96   ;;  %vm891_vm2 = vcmask 64512   ;;  %vm1041_vm3 = vcmask 523264  }
  0x33   : > { %711 = vmatpush.msra.mxu0 %v552_v3  ;;  %v540_v11 = vld [vmem:[#allocation2 + $0xf0] sm:$0xff]  ;;  %v538_v12 = vld [vmem:[#allocation2 + $0xe0] sm:$0xff]  ;;  %v537_v13 = vld [vmem:[#allocation2 + $0xd8] sm:$0xff]  ;;  %s1798_s6 = sshll.u32 %s2352_s5, 3  ;;  %s483_s29 = scalar_lea.vmem %s2573_s3, %s2352_s5  ;;  %vm500_vm1 = vcmp.gt.s32.totalorder %v499_v51, %v497_v50  ;;  %vm1043_vm4 = vcmask 785408   ;;  %vm1316_vm9 = vcmask 130048  }
  0x34   : > { %732 = vmatpush.msra.mxu1 %v550_v4  ;;  %v535_v14 = vld [vmem:[#allocation2 + $0xc8] sm:$0xff]  ;;  %v534_v15 = vld [vmem:[#allocation2 + $0xc0] sm:$0xff]  ;;  %v532_v16 = vld [vmem:[#allocation2 + $0xb0] sm:$0xff]  ;;  %s471_s16 = scalar_lea.vmem %s2570_s0, %s1798_s6  ;;  %v1802_v59 = vsel %vm500_vm1, 1.0, %v2197_v58  ;;  %s480_s15 = scalar_lea.vmem %s2572_s2, %s1798_s6 }
  0x35   : > { %712 = vmatpush.msra.mxu0 %v549_v5  ;;  %v531_v17 = vld [vmem:[#allocation2 + $0xa8] sm:$0xff]  ;;  %v529_v18 = vld [vmem:[#allocation2 + $0x98] sm:$0xff]  ;;  %v528_v19 = vld [vmem:[#allocation2 + $0x90] sm:$0xff]  ;;  %v503_v61 = vmul.f32 -1e+30, %v1802_v59  ;;  %s1835_s6 = sshll.u32 %s2352_s5, 4  ;;  %s486_s21 = scalar_lea.vmem %s2574_s4, %s2352_s5 }
  0x36   : > { %733 = vmatpush.msra.mxu1 %v547_v6  ;;  %v526_v20 = vld [vmem:[#allocation2 + $0x80] sm:$0xff]  ;;  %v525_v21 = vld [vmem:[#allocation2 + $0x78] sm:$0xff]  ;;  %v523_v22 = vld [vmem:[#allocation2 + $0x68] sm:$0xff]  ;;  %s476_s22 = scalar_lea.vmem %s2571_s1, %s1835_s6  ;;  %s465_s28 = sand.u32 1, %s2174_s14  }
  0x37   : > { %713 = vmatpush.msra.mxu0 %v546_v7  ;;  %v522_v23 = vld [vmem:[#allocation2 + $0x60] sm:$0xff]  ;;  %v520_v24 = vld [vmem:[#allocation2 + $0x50] sm:$0xff]  ;;  %v519_v25 = vld [vmem:[#allocation2 + $0x48] sm:$0xff]  ;;  %s1797_s30 = sshll.u32 %s465_s28, 3  ;;  %s1832_s27 = sshll.u32 %s2276_s17, 3 }
  0x38   : > { %734 = vmatpush.msra.mxu1 %v544_v8  ;;  %v517_v26 = vld [vmem:[#allocation2 + $0x38] sm:$0xff]  ;;  %v516_v27 = vld [vmem:[#allocation2 + $0x30] sm:$0xff]  ;;  %v514_v28 = vld [vmem:[#allocation2 + $0x20] sm:$0xff]  ;;  %s467_s19 = scalar_lea.vmem [#allocation10], %s1797_s30  ;;  %s1628_s17 = scalar_lea.sflag [#allocation4], %s465_s28 }
  0x39   : > { %714 = vmatpush.msra.mxu0 %v543_v9  ;;  %v513_v29 = vld [vmem:[#allocation2 + $0x18] sm:$0xff]  ;;  %v511_v30 = vld [vmem:[#allocation2 + $0x8] sm:$0xff]  ;;  %v510_v31 = vld [vmem:[#allocation2] sm:$0xff]  ;;  %s2128_s5 = scalar_lea.hbm %s2580_s10, 16 }
  0x3a   : > { %735 = vmatpush.msra.mxu1 %v541_v10  ;;  %v2360_v32 = vld [vmem:[%s471_s16] sm:$0xff]  ;;  %v2367_v33 = vld [vmem:[%s2579_s9 + $0x8] sm:$0xff]  ;;  %v557_v41 = vld [vmem:[#allocation2 + $0x178] sm:$0xff]  ;;  %s1638_s16 = scalar_lea.hbm %s2580_s10, %s1832_s27 }
  0x3b   : > { %715 = vmatpush.msra.mxu0 %v540_v11  ;;  %v2372_v34 = vld [vmem:[%s2579_s9] sm:$0xff]  ;;  %v708_v35 = vperm.slane %v2367_v33, 0  ;;  %750 = vmatpush.msra.mxu2 %v557_v41  ;;  %v551_v43 = vld [vmem:[#allocation2 + $0x148] sm:$0xff]  ;;  %v548_v44 = vld [vmem:[#allocation2 + $0x130] sm:$0xff]  ;;  %s1642_s23 = sshll.u32 %s1638_s16, 4  ;;  %s1643_s23 = int_to_ptr.hbm [resolvable:$true] %s1642_s23 }
  0x3c   : > { %736 = vmatpush.msra.mxu1 %v538_v12  ;;  %v707_v36 = vperm.slane %v2372_v34, 0  ;;  %v554_v42 = vld [vmem:[#allocation2 + $0x160] sm:$0xff]  ;;  %v545_v47 = vld [vmem:[#allocation2 + $0x118] sm:$0xff]  ;;  %v539_v52 = vld [vmem:[#allocation2 + $0xe8] sm:$0xff]  ;;  %s2122_s24 = sshra.s32 %s1643_s23, 4  ;;  %s2123_s24 = int_to_ptr.hbm [resolvable:$true] %s2122_s24 }
  0x3d   : > { %716 = vmatpush.msra.mxu0 %v537_v13  ;;  %751 = vmatpush.msra.mxu2 %v554_v42  ;;  %v542_v49 = vld [vmem:[#allocation2 + $0x100] sm:$0xff]  ;;  %v536_v53 = vld [vmem:[#allocation2 + $0xd0] sm:$0xff]  ;;  %v533_v54 = vld [vmem:[#allocation2 + $0xb8] sm:$0xff]  ;;  %p2129_p3 = scmp.lt.s32.totalorder %s2123_s24, %s2580_s10 }
  0x3e   : > { %737 = vmatpush.msra.mxu1 %v535_v14  ;;  %v530_v57 = vld [vmem:[#allocation2 + $0xa0] sm:$0xff]  ;;  %v527_v60 = vld [vmem:[#allocation2 + $0x88] sm:$0xff]  ;;  %v524_v63 = vld [vmem:[#allocation2 + $0x70] sm:$0xff] }
  0x3f   : > { %717 = vmatpush.msra.mxu0 %v534_v15  ;;  %752 = vmatpush.msra.mxu2 %v551_v43  ;;  %v1945_v62 = vld [vmem:[%s483_s29] ss:$0 sm:$0xff]  ;;  %v521_v0 = vld [vmem:[#allocation2 + $0x58] sm:$0xff]  ;;  %v515_v4 = vld [vmem:[#allocation2 + $0x28] sm:$0xff] }
  0x40   : > { %738 = vmatpush.msra.mxu1 %v532_v16  ;;  %v508_v2 = vadd.f32 %v1945_v62, %v503_v61  ;;  %v518_v3 = vld [vmem:[#allocation2 + $0x40] sm:$0xff]  ;;  %v512_v9 = vld [vmem:[#allocation2 + $0x10] sm:$0xff] }
  0x41   : > { %718 = vmatpush.msra.mxu0 %v531_v17  ;;  %753 = vmatpush.msra.mxu2 %v548_v44 }
  0x42   : > { %739 = vmatpush.msra.mxu1 %v529_v18 }
  0x43   : > { %719 = vmatpush.msra.mxu0 %v528_v19  ;;  %754 = vmatpush.msra.mxu2 %v545_v47 }
  0x44   : > { %740 = vmatpush.msra.mxu1 %v526_v20 }
  0x45   : > { %720 = vmatpush.msra.mxu0 %v525_v21  ;;  %755 = vmatpush.msra.mxu2 %v542_v49 }
  0x46   : > { %741 = vmatpush.msra.mxu1 %v523_v22 }
  0x47   : > { %721 = vmatpush.msra.mxu0 %v522_v23  ;;  %756 = vmatpush.msra.mxu2 %v539_v52 }
  0x48   : > { %742 = vmatpush.msra.mxu1 %v520_v24  ;;  %v2408_v24 = vld [vmem:[%s2579_s9 + $0x10] sm:$0xff] }
  0x49   : > { %722 = vmatpush.msra.mxu0 %v519_v25  ;;  %757 = vmatpush.msra.mxu2 %v536_v53  ;;  %v709_v25 = vperm.slane %v2408_v24, 0 }
  0x4a   : > { %743 = vmatpush.msra.mxu1 %v517_v26 }
  0x4b   : > { %723 = vmatpush.msra.mxu0 %v516_v27  ;;  %758 = vmatpush.msra.mxu2 %v533_v54 }
  0x4c   : > { %744 = vmatpush.msra.mxu1 %v514_v28 }
  0x4d   : > { %724 = vmatpush.msra.mxu0 %v513_v29  ;;  %759 = vmatpush.msra.mxu2 %v530_v57 }
  0x4e   : > { %745 = vmatpush.msra.mxu1 %v511_v30 }
  0x4f   : > { %725 = vmatpush.msra.mxu0 %v510_v31  ;;  %746 = vmatmul.f32.vlgmr.msra.gmra.mxu1 %v2360_v32 }
  0x50   : > { %726 = vmatmul.f32.vlgmr.msra.gmra.mxu0 %v2360_v32  ;;  %760 = vmatpush.msra.mxu2 %v527_v60 }
  0x52   : > { %761 = vmatpush.msra.mxu2 %v524_v63 }
  0x54   : > { %762 = vmatpush.msra.mxu2 %v521_v0 }
  0x56   : > { %763 = vmatpush.msra.mxu2 %v518_v3  ;;  %v619_v3 = vld [vmem:[#allocation5 + $0x68] sm:$0xff] }
  0x58   : > { %764 = vmatpush.msra.mxu2 %v515_v4  ;;  %v618_v4 = vld [vmem:[#allocation5 + $0x60] sm:$0xff] }
  0x5a   : > { %765 = vmatpush.msra.mxu2 %v512_v9  ;;  %v613_v9 = vld [vmem:[#allocation5 + $0x38] sm:$0xff] }
  0x5b   : > { %766 = vmatmul.f32.vlgmr.msra.gmra.mxu2 %v2360_v32 }
  0xcc   : > { %v747_v37 = vpop.f32.mrf.mxu1 }
  0xcd   : > { %v727_v38 = vpop.f32.mrf.mxu0  ;;  %v748_v39 = vadd.f32 %v747_v37, %v708_v35 }
  0xce   : > { %v728_v40 = vadd.f32 %v727_v38, %v707_v36 }
  0xcf   : > { %782 = vrot.lane.b32.xlu2 %v748_v39, %s2194_s25  ;;  %780 = vrot.lane.b32.xlu1 %v748_v39, %s2195_s11 }
  0xd0   : > { %778 = vrot.lane.b32.xlu0 %v748_v39, %s2196_s20  ;;  %1803 = vmatpush.xpose.msk.msra.mxu3 %vm794_vm0, %v748_v39 }
  0xd3   : > { %1804 = vmatmul.msk.f32.vlgmr.msra.gmra.mxu3 %vm794_vm0, %v728_v40 }
  0xd7   : > { %775 = vrot.lane.b32.xlu2 %v728_v40, %s2194_s25  ;;  %773 = vrot.lane.b32.xlu1 %v728_v40, %s2195_s11 }
  0xd8   : > { %771 = vrot.lane.b32.xlu0 %v728_v40, %s2196_s20 }
  0xde   : > { %v767_v26 = vpop.f32.mrf.mxu2 }
  0xdf   : > { %v768_v27 = vadd.f32 %v767_v26, %v709_v25 }
 0x129   : > { %v783_v56 = vpop.permute.xlu2 %782 }
 0x131   : > { %v776_v8 = vpop.permute.xlu2 %775 }
 0x141   : > { %v781_v45 = vpop.permute.xlu1 %780 }
 0x142   : > { %v779_v48 = vpop.permute.xlu0 %778 }
 0x143   : > { %1805 = vmatpush.xpose.msk.msrb.mxu3 %vm794_vm0, %v779_v48 }
 0x147   : > { %1807 = vmatpush.xpose.msk.msra.mxu3 %vm794_vm0, %v781_v45 }
 0x149   : > { %v774_v1 = vpop.permute.xlu1 %773 }
 0x14a   : > { %v772_v55 = vpop.permute.xlu0 %771 }
 0x14b   : > { %1806 = vmatmul.msk.f32.vlgmr.msrb.gmra.mxu3 %vm794_vm0, %v772_v55 }
 0x14c   : > { %1809 = vmatpush.xpose.msk.msrb.mxu3 %vm794_vm0, %v783_v56 }
 0x153   : > { %1808 = vmatmul.msk.f32.vlgmr.msra.gmra.mxu3 %vm794_vm0, %v774_v1  ;;  %v621_v1 = vld [vmem:[#allocation5 + $0x78] sm:$0xff] }
 0x154   : > { %954 = vmatpush.msra.mxu3 %v768_v27 }
 0x156   : > { %v816_v5 = vpop.f32.mrf.mxu3 }
 0x157   : > { %v817_v6 = vadd.f32 %v816_v5, %v508_v2  ;;  %v617_v5 = vld [vmem:[#allocation5 + $0x58] sm:$0xff] }
 0x159   : > { %v892_v7 = vsel %vm891_vm2, %v817_v6, -inf }
 0x15a   : > { %893 = vmax.xlane.f32.xlu0 %v892_v7  ;;  %v615_v7 = vld [vmem:[#allocation5 + $0x48] sm:$0xff] }
 0x15b   : > { %1810 = vmatmul.msk.f32.vlgmr.msrb.gmra.mxu3 %vm794_vm0, %v776_v8  ;;  %v614_v8 = vld [vmem:[#allocation5 + $0x40] sm:$0xff] }
 0x1cd   : > { %v894_v10 = vpop.xlane.xlu0 %893 }
 0x1ce   : > { %v904_v11 = vsub.f32 %v817_v6, %v894_v10  ;;  %v840_v12 = vpop.f32.mrf.mxu3  ;;  %v616_v6 = vld [vmem:[#allocation5 + $0x50] sm:$0xff] }
 0x1cf   : > { %v841_v22 = vadd.f32 %v840_v12, %v508_v2  ;;  %v612_v10 = vld [vmem:[#allocation5 + $0x30] sm:$0xff]  ;;  %v610_v12 = vld [vmem:[#allocation5 + $0x20] sm:$0xff] }
 0x1d0   : > { %v908_v13 = vmul.f32 1.442695, %v904_v11  ;;  %v611_v11 = vld [vmem:[#allocation5 + $0x28] sm:$0xff] }
 0x1d1   : > { %v895_v23 = vsel %vm891_vm2, %v841_v22, -inf }
 0x1d2   : > { %1947 = vpow2.f32 %v908_v13  ;;  %v609_v13 = vld [vmem:[#allocation5 + $0x18] sm:$0xff] }
 0x1d6   : > { %v864_v14 = vpop.f32.mrf.mxu3 }
 0x1d7   : > { %v865_v15 = vadd.f32 %v864_v14, %v508_v2  ;;  %v608_v14 = vld [vmem:[#allocation5 + $0x10] sm:$0xff] }
 0x1d8   : > { %v1948_v16 = vpop.eup %1947 }
 0x1d9   : > { %v898_v17 = vsel %vm891_vm2, %v865_v15, -inf  ;;  %v916_v18 = vsel %vm891_vm2, %v1948_v16, 0.0 }
 0x1da   : > { %899 = vmax.xlane.f32.xlu1 %v898_v17  ;;  %917 = vadd.xlane.f32.xlu0 %v916_v18 }
 0x1de   : > { %v888_v19 = vpop.f32.mrf.mxu3 }
 0x1df   : > { %v889_v20 = vadd.f32 %v888_v19, %v508_v2  ;;  %v620_v2 = vld [vmem:[#allocation5 + $0x70] sm:$0xff] }
 0x1e1   : > { %v901_v21 = vsel %vm891_vm2, %v889_v20, -inf }
 0x1e2   : > { %902 = vmax.xlane.f32.xlu2 %v901_v21 }
 0x1ea   : > { %896 = vmax.xlane.f32.xlu2 %v895_v23  ;;  %v1045_v23 = vperm.slane %v2372_v34, 1 }
 0x24d   : > { %v900_v28 = vpop.xlane.xlu1 %899  ;;  %v918_v29 = vpop.xlane.xlu0 %917 }
 0x24e   : > { %v906_v30 = vsub.f32 %v865_v15, %v900_v28  ;;  %1949 = vrcp.f32 %v918_v29  ;;  %v607_v15 = vld [vmem:[#allocation5 + $0x8] sm:$0xff]  ;;  %v2198_v28 = vmov 128.0   ;;  %v490_v29 = vld [vmem:[%s480_s15] sm:$0xff] }
 0x250   : > { %v912_v31 = vmul.f32 1.442695, %v906_v30  ;;  %v604_v30 = vld [vmem:[#allocation2 + $0x2f0] sm:$0xff] }
 0x251   : > { %1122 = vmatpush.msrb.mxu1 %v604_v30 }
 0x252   : > { %1951 = vpow2.f32 %v912_v31  ;;  %v601_v31 = vld [vmem:[#allocation2 + $0x2d8] sm:$0xff] }
 0x253   : > { %1123 = vmatpush.msrb.mxu1 %v601_v31 }
 0x254   : > { %v1950_v35 = vpop.eup %1949 }
 0x255   : > { %v932_v36 = vmul.f32 %v1950_v35, %v1948_v16  ;;  %v903_v37 = vpop.xlane.xlu2 %902  ;;  %v606_v16 = vld [vmem:[#allocation5] sm:$0xff]  ;;  %v2199_v35 = vmov 0  }
 0x256   : > { %v907_v38 = vsub.f32 %v889_v20, %v903_v37  ;;  %1928 = vset.pattern.permute.xlu2 %v2199_v35  ;;  %1944 = vset.pattern.permute.xlu0 %v2199_v35 }
 0x257   : > { %1811 = vmatmul.msk.f32.vlgmr.msra.gmra.mxu3 %vm891_vm2, %v932_v36  ;;  %v598_v36 = vld [vmem:[#allocation2 + $0x2c0] sm:$0xff] }
 0x258   : > { %v1952_v39 = vpop.eup %1951  ;;  %v914_v40 = vmul.f32 1.442695, %v907_v38  ;;  %1124 = vmatpush.msrb.mxu1 %v598_v36  ;;  %v592_v38 = vld [vmem:[#allocation2 + $0x290] sm:$0xff] }
 0x259   : > { %v922_v41 = vsel %vm891_vm2, %v1952_v39, 0.0 }
 0x25a   : > { %1953 = vpow2.f32 %v914_v40  ;;  %923 = vadd.xlane.f32.xlu1 %v922_v41  ;;  %v589_v41 = vld [vmem:[#allocation2 + $0x278] sm:$0xff] }
 0x25d   : > { %v897_v42 = vpop.xlane.xlu2 %896 }
 0x25e   : > { %v905_v43 = vsub.f32 %v841_v22, %v897_v42  ;;  %v586_v42 = vld [vmem:[#allocation2 + $0x260] sm:$0xff] }
 0x260   : > { %v1954_v44 = vpop.eup %1953  ;;  %v910_v45 = vmul.f32 1.442695, %v905_v43 }
 0x261   : > { %v925_v46 = vsel %vm891_vm2, %v1954_v44, 0.0 }
 0x262   : > { %1955 = vpow2.f32 %v910_v45  ;;  %926 = vadd.xlane.f32.xlu2 %v925_v46  ;;  %v580_v45 = vld [vmem:[#allocation2 + $0x230] sm:$0xff] }
 0x268   : > { %v1956_v47 = vpop.eup %1955 }
 0x269   : > { %v919_v48 = vsel %vm891_vm2, %v1956_v47, 0.0 }
 0x26a   : > { %920 = vadd.xlane.f32.xlu0 %v919_v48  ;;  %v574_v48 = vld [vmem:[#allocation2 + $0x200] sm:$0xff] }
 0x273   : > { %788 = vrot.lane.b32.xlu1 %v768_v27, %s2195_s11 }
 0x27a   : > { %791 = vrot.lane.b32.xlu2 %v768_v27, %s2194_s25 }
 0x27e   : > { %785 = vrot.lane.b32.xlu0 %v768_v27, %s2196_s20 }
 0x2cd   : > { %v924_v50 = vpop.xlane.xlu1 %923 }
 0x2d5   : > { %v927_v49 = vpop.xlane.xlu2 %926 }
 0x2d6   : > { %1957 = vrcp.f32 %v927_v49 }
 0x2d7   : > { %1959 = vrcp.f32 %v924_v50  ;;  %v571_v50 = vld [vmem:[#allocation2 + $0x1e8] sm:$0xff] }
 0x2da   : > { %v956_v61 = vpop.f32.mrf.mxu3 }
 0x2dc   : > { %v1958_v51 = vpop.eup %1957 }
 0x2dd   : > { %v792_v52 = vpop.permute.xlu2 %791  ;;  %v935_v53 = vmul.f32 %v1958_v51, %v1954_v44  ;;  %v1960_v54 = vpop.eup %1959  ;;  %v583_v44 = vld [vmem:[#allocation2 + $0x248] sm:$0xff]  ;;  %v568_v51 = vld [vmem:[#allocation2 + $0x1d0] sm:$0xff] }
 0x2de   : > { %1023 = vmatpush.msrb.mxu2 %v792_v52  ;;  %v921_v55 = vpop.xlane.xlu0 %920  ;;  %v934_v56 = vmul.f32 %v1960_v54, %v1952_v39  ;;  %v603_v39 = vld [vmem:[#allocation2 + $0x2e8] sm:$0xff] }
 0x2df   : > { %1814 = vmatmul.msk.f32.vlgmr.msrb.gmra.mxu2 %vm891_vm2, %v935_v53  ;;  %1961 = vrcp.f32 %v921_v55  ;;  %v565_v53 = vld [vmem:[#allocation2 + $0x1b8] sm:$0xff] }
 0x2e0   : > { %1963 = vrcp.f32 %v2198_v28  ;;  %v1096_v28 = vperm.slane %v2372_v34, 3 }
 0x2e5   : > { %v789_v57 = vpop.permute.xlu1 %788  ;;  %v1962_v58 = vpop.eup %1961 }
 0x2e6   : > { %1000 = vmatpush.msrb.mxu3 %v789_v57  ;;  %v933_v60 = vmul.f32 %v1962_v58, %v1956_v47  ;;  %v1964_v37 = vpop.eup %1963  ;;  %v577_v47 = vld [vmem:[#allocation2 + $0x218] sm:$0xff]  ;;  %v559_v58 = vld [vmem:[#allocation2 + $0x188] sm:$0xff] }
 0x2e7   : > { %1813 = vmatmul.msk.f32.vlgmr.msrb.gmra.mxu3 %vm891_vm2, %v934_v56  ;;  %v1070_v40 = vmul.f32 128.0, %v1964_v37  ;;  %vm1074_vm5 = vweird.f32 %v1964_v37  ;;  %v562_v56 = vld [vmem:[#allocation2 + $0x1a0] sm:$0xff] }
 0x2e8   : > { %1046 = vmatpush.msra.mxu3 %v621_v1  ;;  %v591_v1 = vld [vmem:[#allocation2 + $0x288] sm:$0xff] }
 0x2e9   : > { %v1071_v43 = vsub.f32 1.0, %v1070_v40 }
 0x2ea   : > { %1047 = vmatpush.msra.mxu3 %v620_v2  ;;  %v588_v2 = vld [vmem:[#allocation2 + $0x270] sm:$0xff] }
 0x2eb   : > { %v1072_v46 = vmul.f32 %v1964_v37, %v1071_v43 }
 0x2ec   : > { %1048 = vmatpush.msra.mxu3 %v619_v3  ;;  %v585_v3 = vld [vmem:[#allocation2 + $0x258] sm:$0xff] }
 0x2ed   : > { %v1073_v49 = vadd.f32 %v1964_v37, %v1072_v46  ;;  %v602_v46 = vld [vmem:[#allocation2 + $0x2e0] sm:$0xff] }
 0x2ee   : > { %1049 = vmatpush.msra.mxu3 %v618_v4  ;;  %v582_v4 = vld [vmem:[#allocation2 + $0x240] sm:$0xff] }
 0x2ef   : > { %v2434_v52 = vsel %vm1074_vm5, %v1964_v37, %v1073_v49  ;;  %v596_v49 = vld [vmem:[#allocation2 + $0x2b0] sm:$0xff] }
 0x2f0   : > { %v786_v59 = vpop.permute.xlu0 %785  ;;  %1050 = vmatpush.msra.mxu3 %v617_v5  ;;  %v579_v5 = vld [vmem:[#allocation2 + $0x228] sm:$0xff] }
 0x2f1   : > { %977 = vmatpush.msrb.mxu0 %v786_v59  ;;  %v2441_v59 = vld [vmem:[%s476_s22] sm:$0xff] }
 0x2f2   : > { %1812 = vmatmul.msk.f32.vlgmr.msrb.gmra.mxu0 %vm891_vm2, %v933_v60  ;;  %1051 = vmatpush.msra.mxu3 %v616_v6  ;;  %v576_v6 = vld [vmem:[#allocation2 + $0x210] sm:$0xff] }
 0x2f3   : > { %1100 = vmatpush.msra.mxu0 %v603_v39 }
 0x2f4   : > { %1052 = vmatpush.msra.mxu3 %v615_v7  ;;  %v573_v7 = vld [vmem:[#allocation2 + $0x1f8] sm:$0xff] }
 0x2f6   : > { %1053 = vmatpush.msra.mxu3 %v614_v8  ;;  %v570_v8 = vld [vmem:[#allocation2 + $0x1e0] sm:$0xff] }
 0x2f8   : > { %1054 = vmatpush.msra.mxu3 %v613_v9  ;;  %v567_v9 = vld [vmem:[#allocation2 + $0x1c8] sm:$0xff] }
 0x2fa   : > { %1055 = vmatpush.msra.mxu3 %v612_v10  ;;  %v564_v10 = vld [vmem:[#allocation2 + $0x1b0] sm:$0xff] }
 0x2fc   : > { %1056 = vmatpush.msra.mxu3 %v611_v11  ;;  %v561_v11 = vld [vmem:[#allocation2 + $0x198] sm:$0xff] }
 0x2fe   : > { %1057 = vmatpush.msra.mxu3 %v610_v12  ;;  %v558_v12 = vld [vmem:[#allocation2 + $0x180] sm:$0xff] }
 0x300   : > { %1058 = vmatpush.msra.mxu3 %v609_v13 }
 0x302   : > { %1059 = vmatpush.msra.mxu3 %v608_v14 }
 0x304   : > { %1060 = vmatpush.msra.mxu3 %v607_v15 }
 0x306   : > { %1061 = vmatpush.msra.mxu3 %v606_v16  ;;  %v1120_v16 = vperm.slane %v2367_v33, 4 }
 0x362   : > { %v1025_v62 = vpop.f32.mrf.mxu2 }
 0x363   : > { %1037 = vrot.lane.b32.xlu2 %v1025_v62, %s2196_s20  ;;  %v600_v62 = vld [vmem:[#allocation2 + $0x2d0] sm:$0xff] }
 0x364   : > { %1101 = vmatpush.msra.mxu0 %v600_v62  ;;  %v1946_v62 = vld [vmem:[%s486_s21] ss:$0 sm:$0xff]  ;;  %s2124_s21 = scalar_lea.hbm %s2123_s24, 8 }
 0x365   : > { %p2125_p0 = scmp.ne.s32.totalorder %s2123_s24, %s2124_s21  ;;  %p2130_p4 = scmp.lt.s32.totalorder %s2128_s5, %s2124_s21 }
 0x367   : > { %p2126_p1 = pnand %p2125_p0, %p2293_p5  ;;  %p2131_p7 = por %p2130_p4, %p2129_p3 }
 0x369   : > { %p2127_p2 = pneg %p2126_p1 }
 0x36a   : > { %v1002_v63 = vpop.f32.mrf.mxu3 }
 0x36b   : > { %1033 = vrot.lane.b32.xlu0 %v1002_v63, %s2195_s11  ;;  %493 = vperm.xlu2 %1928, %v490_v29   ;;  %v597_v63 = vld [vmem:[#allocation2 + $0x2b8] sm:$0xff]  ;;  %p2132_p8 = pnand %p2131_p7, %p2127_p2 }
 0x36c   : > { %1102 = vmatpush.msra.mxu0 %v597_v63 }
 0x36f   : > { %v979_v0 = vpop.f32.mrf.mxu0 }
 0x370   : > { %1029 = vrot.lane.b32.xlu1 %v979_v0, %s2194_s25  ;;  %v594_v0 = vld [vmem:[#allocation2 + $0x2a0] sm:$0xff] }
 0x371   : > { %1103 = vmatpush.msra.mxu0 %v594_v0 }
 0x373   : > { %1104 = vmatpush.msra.mxu0 %v591_v1 }
 0x375   : > { %1105 = vmatpush.msra.mxu0 %v588_v2  ;;  %v572_v2 = vld [vmem:[#allocation2 + $0x1f0] sm:$0xff] }
 0x377   : > { %1106 = vmatpush.msra.mxu0 %v585_v3  ;;  %v569_v3 = vld [vmem:[#allocation2 + $0x1d8] sm:$0xff] }
 0x379   : > { %1107 = vmatpush.msra.mxu0 %v582_v4  ;;  %v566_v4 = vld [vmem:[#allocation2 + $0x1c0] sm:$0xff] }
 0x37b   : > { %1108 = vmatpush.msra.mxu0 %v579_v5  ;;  %v563_v5 = vld [vmem:[#allocation2 + $0x1a8] sm:$0xff] }
 0x37d   : > { %1109 = vmatpush.msra.mxu0 %v576_v6  ;;  %v560_v6 = vld [vmem:[#allocation2 + $0x190] sm:$0xff] }
 0x37f   : > { %1110 = vmatpush.msra.mxu0 %v573_v7 }
 0x381   : > { %1111 = vmatpush.msra.mxu0 %v570_v8 }
 0x383   : > { %1112 = vmatpush.msra.mxu0 %v567_v9 }
 0x385   : > { %1113 = vmatpush.msra.mxu0 %v564_v10 }
 0x387   : > { %1114 = vmatpush.msra.mxu0 %v561_v11 }
 0x389   : > { %1115 = vmatpush.msra.mxu0 %v558_v12 }
 0x3bd   : > { %v1038_v20 = vpop.permute.xlu2 %1037 }
 0x3c5   : > { %v2452_v30 = vpop.permute.xlu2 %493 }
 0x3dd   : > { %v1034_v18 = vpop.permute.xlu0 %1033 }
 0x3e2   : > { %v1030_v17 = vpop.permute.xlu1 %1029 }
 0x3e3   : > { %v1040_v19 = vsel %vm794_vm0, %v956_v61, %v1030_v17  ;;  %v2444_v61 = vld [vmem:[%s476_s22 + $0x8] sm:$0xff]  ;;  %s1640_s22 = sshll.u32 %s467_s19, 4  ;;  %s1641_s22 = int_to_ptr.vmem [resolvable:$true] %s1640_s22 }
 0x3e4   : > { %v1042_v21 = vsel %vm1041_vm3, %v1040_v19, %v1034_v18 }
 0x3e5   : > { %v1044_v22 = vsel %vm1043_vm4, %v1042_v21, %v1038_v20 }
 0x3e6   : > { %1062 = vmatmul.f32.vlgmr.msra.gmra.mxu3 %v1044_v22 }
 0x469   : > { %v1063_v25 = vpop.f32.mrf.mxu3 }
 0x46a   : > { %v1064_v26 = vadd.f32 %v1063_v25, %v1045_v23 }
 0x46c   : > { %v1066_v27 = vadd.f32 %v1064_v26, %v2360_v32  ;;  %v595_v32 = vld [vmem:[#allocation2 + $0x2a8] sm:$0xff]  ;;  %v1094_v26 = vperm.slane %v2372_v34, 2 }
 0x46d   : > { %1125 = vmatpush.msrb.mxu1 %v595_v32  ;;  %v1099_v32 = vperm.slane %v2372_v34, 4 }
 0x46e   : > { %1067 = vadd.xlane.f32.xlu1 %v1066_v27 }
 0x46f   : > { %1126 = vmatpush.msrb.mxu1 %v592_v38 }
 0x471   : > { %1127 = vmatpush.msrb.mxu1 %v589_v41 }
 0x473   : > { %1128 = vmatpush.msrb.mxu1 %v586_v42 }
 0x475   : > { %1129 = vmatpush.msrb.mxu1 %v583_v44 }
 0x477   : > { %1130 = vmatpush.msrb.mxu1 %v580_v45  ;;  %v605_v45 = vld [vmem:[#allocation2 + $0x2f8] sm:$0xff] }
 0x478   : > { %1145 = vmatpush.msra.mxu2 %v605_v45 }
 0x479   : > { %1131 = vmatpush.msrb.mxu1 %v577_v47 }
 0x47a   : > { %1146 = vmatpush.msra.mxu2 %v602_v46 }
 0x47b   : > { %1132 = vmatpush.msrb.mxu1 %v574_v48  ;;  %v599_v48 = vld [vmem:[#allocation2 + $0x2c8] sm:$0xff] }
 0x47c   : > { %1147 = vmatpush.msra.mxu2 %v599_v48 }
 0x47d   : > { %1133 = vmatpush.msrb.mxu1 %v571_v50  ;;  %v593_v50 = vld [vmem:[#allocation2 + $0x298] sm:$0xff] }
 0x47e   : > { %1148 = vmatpush.msra.mxu2 %v596_v49 }
 0x47f   : > { %1134 = vmatpush.msrb.mxu1 %v568_v51  ;;  %v590_v51 = vld [vmem:[#allocation2 + $0x280] sm:$0xff] }
 0x480   : > { %1149 = vmatpush.msra.mxu2 %v593_v50 }
 0x481   : > { %1135 = vmatpush.msrb.mxu1 %v565_v53 }
 0x482   : > { %1150 = vmatpush.msra.mxu2 %v590_v51 }
 0x483   : > { %1136 = vmatpush.msrb.mxu1 %v562_v56  ;;  %v581_v56 = vld [vmem:[#allocation2 + $0x238] sm:$0xff] }
 0x485   : > { %1137 = vmatpush.msrb.mxu1 %v559_v58 }
 0x486   : > { %1138 = vmatmul.f32.vlgmr.msrb.gmra.mxu1 %v2441_v59 }
 0x48e   : > { %1141 = vmatmul.f32.gmra.mxu1 %v2444_v61 }
 0x4e1   : > { %v1068_v54 = vpop.xlane.xlu1 %1067 }
 0x4e2   : > { %v1076_v55 = vmul.f32 %v2434_v52, %v1068_v54  ;;  %v587_v54 = vld [vmem:[#allocation2 + $0x268] sm:$0xff] }
 0x4e3   : > { %1151 = vmatpush.msra.mxu2 %v587_v54 }
 0x4e4   : > { %v1077_v57 = vsub.f32 %v1066_v27, %v1076_v55  ;;  %v584_v55 = vld [vmem:[#allocation2 + $0x250] sm:$0xff] }
 0x4e5   : > { %1152 = vmatpush.msra.mxu2 %v584_v55 }
 0x4e6   : > { %v1078_v60 = vmul.f32 %v1077_v57, %v1077_v57 }
 0x4e7   : > { %1153 = vmatpush.msra.mxu2 %v581_v56 }
 0x4e8   : > { %1079 = vadd.xlane.f32.xlu0 %v1078_v60  ;;  %v575_v60 = vld [vmem:[#allocation2 + $0x208] sm:$0xff] }
 0x503   : > { %v1139_v17 = vpop.f32.mrf.mxu1 }
 0x504   : > { %v1140_v19 = vadd.f32 %v1139_v17, %v1120_v16 }
 0x506   : > { %1177 = vrot.lane.b32.xlu1 %v1140_v19, %s2196_s20 }
 0x50b   : > { %v1142_v36 = vpop.f32.mrf.mxu1 }
 0x50c   : > { %v1143_v37 = vadd.f32 %v1142_v36, %v1120_v16 }
 0x50e   : > { %1183 = vrot.lane.b32.xlu2 %v1143_v37, %s2195_s11  ;;  %1815 = vmatpush.xpose.msk.msrb.mxu3 %vm794_vm0, %v1143_v37 }
 0x512   : > { %1816 = vmatpush.xpose.msk.msrb.mxu3 %vm794_vm0, %v1140_v19 }
 0x516   : > { %1181 = vrot.lane.b32.xlu2 %v1140_v19, %s2195_s11 }
 0x51e   : > { %1179 = vrot.lane.b32.xlu2 %v1143_v37, %s2196_s20 }
 0x55b   : > { %v1080_v13 = vpop.xlane.xlu0 %1079 }
 0x55c   : > { %v1081_v14 = vmul.f32 %v1080_v13, %v2434_v52 }
 0x55e   : > { %v1082_v15 = vadd.f32 1e-05, %v1081_v14 }
 0x560   : > { %1965 = vrsqrt.f32 %v1082_v15  ;;  %vm1089_vm7 = vweird.f32 %v1082_v15 }
 0x566   : > { %v1966_v18 = vpop.eup %1965 }
 0x567   : > { %v1084_v20 = vmul.f32 %v1966_v18, %v1082_v15  ;;  %vm1090_vm6 = vweird.f32 %v1966_v18 }
 0x568   : > { %vm1091_vm8 = vmor %vm1089_vm7, %vm1090_vm6  ;;  %v1184_v40 = vpop.permute.xlu2 %1183 }
 0x569   : > { %v1085_v21 = vmul.f32 %v1966_v18, %v1084_v20  ;;  %1821 = vmatpush.xpose.msk.msra.mxu3 %vm794_vm0, %v1184_v40  ;;  %v1121_v20 = vperm.slane %v2408_v24, 4 }
 0x56b   : > { %v1086_v22 = vmul.f32 0.5, %v1085_v21 }
 0x56d   : > { %v1087_v23 = vsub.f32 1.5, %v1086_v22 }
 0x56f   : > { %v1088_v25 = vmul.f32 %v1966_v18, %v1087_v23 }
 0x570   : > { %v1182_v34 = vpop.permute.xlu2 %1181 }
 0x571   : > { %v1092_v27 = vsel %vm1091_vm8, %v1966_v18, %v1088_v25  ;;  %1822 = vmatpush.xpose.msk.msra.mxu3 %vm794_vm0, %v1182_v34 }
 0x572   : > { %v1093_v33 = vmul.f32 %v1092_v27, %v1077_v57  ;;  %v578_v57 = vld [vmem:[#allocation2 + $0x220] sm:$0xff] }
 0x573   : > { %1154 = vmatpush.msra.mxu2 %v578_v57 }
 0x574   : > { %v1095_v29 = vmul.f32 %v1094_v26, %v1093_v33 }
 0x575   : > { %1155 = vmatpush.msra.mxu2 %v575_v60 }
 0x576   : > { %v1097_v31 = vadd.f32 %v1096_v28, %v1095_v29 }
 0x577   : > { %1156 = vmatpush.msra.mxu2 %v572_v2 }
 0x578   : > { %v2455_v35 = vmul.f32 %v1097_v31, %v2452_v30  ;;  %v1180_v41 = vpop.permute.xlu2 %1179  ;;  %v1178_v42 = vpop.permute.xlu1 %1177 }
 0x579   : > { %1818 = vmatpush.xpose.msk.msrb.mxu0 %vm794_vm0, %v1180_v41  ;;  %1157 = vmatpush.msra.mxu2 %v569_v3 }
 0x57a   : > { %1116 = vmatmul.f32.vlgmr.msra.gmra.mxu0 %v2455_v35 }
 0x57b   : > { %1158 = vmatpush.msra.mxu2 %v566_v4 }
 0x57d   : > { %1819 = vmatpush.xpose.msk.msrb.mxu0 %vm794_vm0, %v1178_v42  ;;  %1159 = vmatpush.msra.mxu2 %v563_v5 }
 0x57f   : > { %1160 = vmatpush.msra.mxu2 %v560_v6  ;;  %v637_v6 = vld [vmem:[#allocation5 + $0xf8] sm:$0xff] }
 0x580   : > { %1161 = vmatmul.f32.vlgmr.msra.gmra.mxu2 %v2441_v59  ;;  %1469 = vmatpush.msra.mxu1 %v637_v6  ;;  %v639_v6 = vld [vmem:[#allocation7 + $0x8] sm:$0xff] }
 0x588   : > { %1164 = vmatmul.f32.gmra.mxu2 %v2444_v61 }
 0x5f7   : > { %v1117_v38 = vpop.f32.mrf.mxu0 }
 0x5f8   : > { %v1118_v39 = vadd.f32 %v1117_v38, %v1099_v32 }
 0x5fa   : > { %1169 = vrot.lane.b32.xlu0 %v1118_v39, %s2196_s20  ;;  %1171 = vrot.lane.b32.xlu2 %v1118_v39, %s2195_s11 }
 0x5fb   : > { %1817 = vmatmul.msk.f32.vlgmr.msrb.gmra.mxu3 %vm794_vm0, %v1118_v39 }
 0x602   : > { %1187 = vrot.lane.b32.xlu2 %v1143_v37, %s2194_s25 }
 0x60a   : > { %1185 = vrot.lane.b32.xlu2 %v1140_v19, %s2194_s25  ;;  %v1162_v19 = vpop.f32.mrf.mxu2 }
 0x60b   : > { %v1163_v21 = vadd.f32 %v1162_v19, %v1121_v20  ;;  %v622_v19 = vld [vmem:[#allocation5 + $0x80] sm:$0xff] }
 0x612   : > { %1173 = vrot.lane.b32.xlu2 %v1118_v39, %s2194_s25  ;;  %v1165_v22 = vpop.f32.mrf.mxu2 }
 0x613   : > { %v1166_v25 = vadd.f32 %v1165_v22, %v1121_v20 }
 0x615   : > { %1378 = vmatpush.msrb.mxu2 %v1166_v25  ;;  %v1929_v27 = vpack.i.bf16 %v1163_v21, %v1166_v25 }
 0x617   : > { %1379 = vmatpush.msrb.mxu2 %v1163_v21 }
 0x654   : > { %v1172_v43 = vpop.permute.xlu2 %1171 }
 0x655   : > { %1823 = vmatmul.msk.f32.vlgmr.msra.gmra.mxu3 %vm794_vm0, %v1172_v43 }
 0x65c   : > { %v1188_v44 = vpop.permute.xlu2 %1187 }
 0x65d   : > { %1824 = vmatpush.xpose.msk.msra.mxu0 %vm794_vm0, %v1188_v44 }
 0x664   : > { %v1186_v47 = vpop.permute.xlu2 %1185 }
 0x665   : > { %1825 = vmatpush.xpose.msk.msra.mxu0 %vm794_vm0, %v1186_v47 }
 0x66c   : > { %v1170_v53 = vpop.permute.xlu0 %1169  ;;  %v1174_v58 = vpop.permute.xlu2 %1173 }
 0x66d   : > { %1820 = vmatmul.msk.f32.vlgmr.msrb.gmra.mxu0 %vm794_vm0, %v1170_v53 }
 0x675   : > { %1826 = vmatmul.msk.f32.vlgmr.msra.gmra.mxu0 %vm794_vm0, %v1174_v58 }
 0x67e   : > { %v1235_v63 = vpop.f32.mrf.mxu3 }
 0x67f   : > { %v1236_v0 = vadd.f32 %v1946_v62, %v1235_v63 }
 0x681   : > { %v1317_v1 = vsel %vm1316_vm9, %v1236_v0, -inf }
 0x682   : > { %1318 = vmax.xlane.f32.xlu0 %v1317_v1 }
 0x6d8   : > { %v1287_v7 = vpop.f32.mrf.mxu3 }
 0x6d9   : > { %v1288_v8 = vadd.f32 %v1946_v62, %v1287_v7  ;;  %v636_v7 = vld [vmem:[#allocation5 + $0xf0] sm:$0xff] }
 0x6da   : > { %1470 = vmatpush.msra.mxu1 %v636_v7  ;;  %v685_v7 = vld [vmem:[#allocation8 + $0x78] sm:$0xff] }
 0x6db   : > { %v1323_v9 = vsel %vm1316_vm9, %v1288_v8, -inf }
 0x6dc   : > { %1324 = vmax.xlane.f32.xlu2 %v1323_v9  ;;  %v634_v9 = vld [vmem:[#allocation5 + $0xe0] sm:$0xff] }
 0x6ea   : > { %v1261_v10 = vpop.f32.mrf.mxu0 }
 0x6eb   : > { %v1262_v11 = vadd.f32 %v1946_v62, %v1261_v10  ;;  %v633_v10 = vld [vmem:[#allocation5 + $0xd8] sm:$0xff] }
 0x6ed   : > { %v1320_v12 = vsel %vm1316_vm9, %v1262_v11, -inf }
 0x6ee   : > { %1321 = vmax.xlane.f32.xlu1 %v1320_v12  ;;  %v631_v12 = vld [vmem:[#allocation5 + $0xc8] sm:$0xff] }
 0x6f2   : > { %v1313_v13 = vpop.f32.mrf.mxu0 }
 0x6f3   : > { %v1314_v14 = vadd.f32 %v1946_v62, %v1313_v13  ;;  %v630_v13 = vld [vmem:[#allocation5 + $0xc0] sm:$0xff] }
 0x6f5   : > { %v1319_v15 = vpop.xlane.xlu0 %1318  ;;  %v1326_v16 = vsel %vm1316_vm9, %v1314_v14, -inf }
 0x6f6   : > { %v1329_v17 = vsub.f32 %v1236_v0, %v1319_v15  ;;  %1327 = vmax.xlane.f32.xlu0 %v1326_v16  ;;  %v628_v15 = vld [vmem:[#allocation5 + $0xb0] sm:$0xff]  ;;  %v627_v16 = vld [vmem:[#allocation5 + $0xa8] sm:$0xff] }
 0x6f8   : > { %v1333_v59 = vmul.f32 1.442695, %v1329_v17  ;;  %v626_v17 = vld [vmem:[#allocation5 + $0xa0] sm:$0xff] }
 0x6fa   : > { %1967 = vpow2.f32 %v1333_v59  ;;  %v625_v59 = vld [vmem:[#allocation5 + $0x98] sm:$0xff] }
 0x700   : > { %v1968_v61 = vpop.eup %1967 }
 0x701   : > { %v1341_v18 = vsel %vm1316_vm9, %v1968_v61, 0.0 }
 0x702   : > { %1342 = vadd.xlane.f32.xlu1 %v1341_v18  ;;  %v623_v18 = vld [vmem:[#allocation5 + $0x88] sm:$0xff] }
 0x71b   : > { %1930 = vrot.lane.b32.xlu1 %v1929_v27, %s2196_s20 }
 0x74f   : > { %v1325_v23 = vpop.xlane.xlu2 %1324 }
 0x750   : > { %v1331_v26 = vsub.f32 %v1288_v8, %v1325_v23  ;;  %v635_v8 = vld [vmem:[#allocation5 + $0xe8] sm:$0xff] }
 0x751   : > { %1471 = vmatpush.msra.mxu1 %v635_v8  ;;  %v701_v8 = vld [vmem:[#allocation8 + $0xf8] sm:$0xff] }
 0x752   : > { %v1337_v28 = vmul.f32 1.442695, %v1331_v26 }
 0x753   : > { %1472 = vmatpush.msra.mxu1 %v634_v9  ;;  %v684_v9 = vld [vmem:[#allocation8 + $0x70] sm:$0xff] }
 0x754   : > { %1969 = vpow2.f32 %v1337_v28 }
 0x755   : > { %1473 = vmatpush.msra.mxu1 %v633_v10 }
 0x75a   : > { %v1970_v33 = vpop.eup %1969 }
 0x75b   : > { %v1347_v29 = vsel %vm1316_vm9, %v1970_v33, 0.0 }
 0x75c   : > { %1348 = vadd.xlane.f32.xlu0 %v1347_v29 }
 0x761   : > { %v1322_v31 = vpop.xlane.xlu1 %1321 }
 0x762   : > { %v1330_v36 = vsub.f32 %v1262_v11, %v1322_v31  ;;  %v632_v11 = vld [vmem:[#allocation5 + $0xd0] sm:$0xff] }
 0x763   : > { %1474 = vmatpush.msra.mxu1 %v632_v11  ;;  %v700_v11 = vld [vmem:[#allocation8 + $0xf0] sm:$0xff] }
 0x764   : > { %v1335_v37 = vmul.f32 1.442695, %v1330_v36  ;;  %v668_v36 = vld [vmem:[#allocation7 + $0xf0] sm:$0xff] }
 0x765   : > { %1475 = vmatpush.msra.mxu1 %v631_v12 }
 0x766   : > { %1971 = vpow2.f32 %v1335_v37  ;;  %v669_v37 = vld [vmem:[#allocation7 + $0xf8] sm:$0xff] }
 0x767   : > { %1476 = vmatpush.msra.mxu1 %v630_v13  ;;  %v683_v13 = vld [vmem:[#allocation8 + $0x68] sm:$0xff] }
 0x769   : > { %v1328_v24 = vpop.xlane.xlu0 %1327 }
 0x76a   : > { %v1332_v32 = vsub.f32 %v1314_v14, %v1328_v24  ;;  %v629_v14 = vld [vmem:[#allocation5 + $0xb8] sm:$0xff] }
 0x76b   : > { %1477 = vmatpush.msra.mxu1 %v629_v14  ;;  %v699_v14 = vld [vmem:[#allocation8 + $0xe8] sm:$0xff] }
 0x76c   : > { %v1972_v38 = vpop.eup %1971  ;;  %v1339_v39 = vmul.f32 1.442695, %v1332_v32 }
 0x76d   : > { %v1344_v40 = vsel %vm1316_vm9, %v1972_v38, 0.0  ;;  %1478 = vmatpush.msra.mxu1 %v628_v15 }
 0x76e   : > { %1973 = vpow2.f32 %v1339_v39  ;;  %1345 = vadd.xlane.f32.xlu2 %v1344_v40  ;;  %v666_v40 = vld [vmem:[#allocation7 + $0xe0] sm:$0xff] }
 0x76f   : > { %1479 = vmatpush.msra.mxu1 %v627_v16  ;;  %v682_v16 = vld [vmem:[#allocation8 + $0x60] sm:$0xff] }
 0x771   : > { %1480 = vmatpush.msra.mxu1 %v626_v17  ;;  %v698_v17 = vld [vmem:[#allocation8 + $0xe0] sm:$0xff] }
 0x773   : > { %1481 = vmatpush.msra.mxu1 %v625_v59  ;;  %v681_v59 = vld [vmem:[#allocation8 + $0x58] sm:$0xff] }
 0x774   : > { %v1974_v34 = vpop.eup %1973 }
 0x775   : > { %v1343_v41 = vpop.xlane.xlu1 %1342  ;;  %v1350_v42 = vsel %vm1316_vm9, %v1974_v34, 0.0 }
 0x776   : > { %1975 = vrcp.f32 %v1343_v41  ;;  %1351 = vadd.xlane.f32.xlu0 %v1350_v42  ;;  %v664_v41 = vld [vmem:[#allocation7 + $0xd0] sm:$0xff]  ;;  %v662_v42 = vld [vmem:[#allocation7 + $0xc0] sm:$0xff] }
 0x77c   : > { %v1976_v43 = vpop.eup %1975 }
 0x77d   : > { %v1357_v44 = vmul.f32 %v1976_v43, %v1968_v61  ;;  %v624_v61 = vld [vmem:[#allocation5 + $0x90] sm:$0xff]  ;;  %v663_v43 = vld [vmem:[#allocation7 + $0xc8] sm:$0xff] }
 0x77e   : > { %1482 = vmatpush.msra.mxu1 %v624_v61  ;;  %v697_v61 = vld [vmem:[#allocation8 + $0xd8] sm:$0xff] }
 0x77f   : > { %1827 = vmatmul.msk.f32.vlgmr.msrb.gmra.mxu2 %vm1316_vm9, %v1357_v44  ;;  %v660_v44 = vld [vmem:[#allocation7 + $0xb0] sm:$0xff] }
 0x780   : > { %1483 = vmatpush.msra.mxu1 %v623_v18  ;;  %v680_v18 = vld [vmem:[#allocation8 + $0x50] sm:$0xff] }
 0x782   : > { %1484 = vmatpush.msra.mxu1 %v622_v19  ;;  %v696_v19 = vld [vmem:[#allocation8 + $0xd0] sm:$0xff] }
 0x784   : > { %1580 = vmatpush.msrb.mxu1 %v701_v8 }
 0x786   : > { %1935 = vrot.lane.b32.xlu2 %v1929_v27, %s2195_s11  ;;  %1581 = vmatpush.msrb.mxu1 %v700_v11 }
 0x788   : > { %1582 = vmatpush.msrb.mxu1 %v699_v14 }
 0x78a   : > { %1940 = vrot.lane.b32.xlu0 %v1929_v27, %s2194_s25  ;;  %v2515_v27 = vld [vmem:[%s2579_s9] sm:$0xff]  ;;  %1583 = vmatpush.msrb.mxu1 %v698_v17 }
 0x78b   : > { %v1468_v28 = vperm.slane %v2515_v27, 5 }
 0x78c   : > { %1584 = vmatpush.msrb.mxu1 %v697_v61 }
 0x78d   : > { %v1931_v45 = vpop.permute.xlu1 %1930 }
 0x78e   : > { %v1932_v46 = vunpack.i.l.bf16 %v1931_v45  ;;  %v1933_v47 = vunpack.i.h.bf16 %v1931_v45  ;;  %v661_v45 = vld [vmem:[#allocation7 + $0xb8] sm:$0xff]  ;;  %1585 = vmatpush.msrb.mxu1 %v696_v19 }
 0x790   : > { %1401 = vmatpush.msra.mxu2 %v1932_v46  ;;  %v658_v46 = vld [vmem:[#allocation7 + $0xa0] sm:$0xff] }
 0x792   : > { %1402 = vmatpush.msra.mxu2 %v1933_v47  ;;  %v659_v47 = vld [vmem:[#allocation7 + $0xa8] sm:$0xff] }
 0x794   : > { %1517 = vmatpush.msrb.mxu2 %v668_v36  ;;  %v692_v36 = vld [vmem:[#allocation8 + $0xb0] sm:$0xff] }
 0x796   : > { %1518 = vmatpush.msrb.mxu2 %v666_v40  ;;  %v674_v40 = vld [vmem:[#allocation8 + $0x20] sm:$0xff] }
 0x798   : > { %1519 = vmatpush.msrb.mxu2 %v664_v41 }
 0x79a   : > { %1520 = vmatpush.msrb.mxu2 %v662_v42  ;;  %v673_v42 = vld [vmem:[#allocation8 + $0x18] sm:$0xff] }
 0x79c   : > { %1521 = vmatpush.msrb.mxu2 %v660_v44 }
 0x79e   : > { %1522 = vmatpush.msrb.mxu2 %v658_v46  ;;  %v1512_v46 = vperm.slane %v2515_v27, 7 }
 0x7cf   : > { %v1349_v48 = vpop.xlane.xlu0 %1348 }
 0x7e1   : > { %v1346_v49 = vpop.xlane.xlu2 %1345 }
 0x7e2   : > { %1977 = vrcp.f32 %v1346_v49  ;;  %v657_v49 = vld [vmem:[#allocation7 + $0x98] sm:$0xff] }
 0x7e3   : > { %1979 = vrcp.f32 %v1349_v48  ;;  %v656_v48 = vld [vmem:[#allocation7 + $0x90] sm:$0xff] }
 0x7e4   : > { %1523 = vmatpush.msrb.mxu2 %v656_v48 }
 0x7e8   : > { %v1978_v50 = vpop.eup %1977 }
 0x7e9   : > { %v1358_v51 = vmul.f32 %v1978_v50, %v1972_v38  ;;  %v1936_v53 = vpop.permute.xlu2 %1935  ;;  %v1980_v54 = vpop.eup %1979  ;;  %v654_v50 = vld [vmem:[#allocation7 + $0x80] sm:$0xff] }
 0x7ea   : > { %v1937_v55 = vunpack.i.l.bf16 %v1936_v53  ;;  %v1938_v56 = vunpack.i.h.bf16 %v1936_v53  ;;  %v1359_v57 = vmul.f32 %v1980_v54, %v1970_v33  ;;  %v1352_v58 = vpop.xlane.xlu0 %1351  ;;  %1524 = vmatpush.msrb.mxu2 %v654_v50  ;;  %v652_v53 = vld [vmem:[#allocation7 + $0x70] sm:$0xff]  ;;  %v653_v54 = vld [vmem:[#allocation7 + $0x78] sm:$0xff] }
 0x7eb   : > { %1828 = vmatmul.msk.f32.vlgmr.msra.gmra.mxu2 %vm1316_vm9, %v1358_v51  ;;  %1981 = vrcp.f32 %v1352_v58  ;;  %v655_v51 = vld [vmem:[#allocation7 + $0x88] sm:$0xff]  ;;  %v649_v58 = vld [vmem:[#allocation7 + $0x58] sm:$0xff]  ;;  %v672_v50 = vld [vmem:[#allocation8 + $0x10] sm:$0xff] }
 0x7ec   : > { %1424 = vmatpush.msrb.mxu3 %v1937_v55  ;;  %1525 = vmatpush.msrb.mxu2 %v652_v53  ;;  %v650_v55 = vld [vmem:[#allocation7 + $0x60] sm:$0xff]  ;;  %v671_v53 = vld [vmem:[#allocation8 + $0x8] sm:$0xff] }
 0x7ee   : > { %1425 = vmatpush.msrb.mxu3 %v1938_v56  ;;  %v651_v56 = vld [vmem:[#allocation7 + $0x68] sm:$0xff]  ;;  %1526 = vmatpush.msrb.mxu2 %v650_v55  ;;  %v670_v55 = vld [vmem:[#allocation8] sm:$0xff] }
 0x7ef   : > { %1829 = vmatmul.msk.f32.vlgmr.msrb.gmra.mxu3 %vm1316_vm9, %v1359_v57  ;;  %v648_v57 = vld [vmem:[#allocation7 + $0x50] sm:$0xff] }
 0x7f0   : > { %1537 = vmatpush.msra.mxu3 %v669_v37  ;;  %1527 = vmatpush.msrb.mxu2 %v648_v57 }
 0x7f1   : > { %v1982_v62 = vpop.eup %1981 }
 0x7f2   : > { %v1360_v1 = vmul.f32 %v1982_v62, %v1974_v34  ;;  %v667_v34 = vld [vmem:[#allocation7 + $0xe8] sm:$0xff] }
 0x7f3   : > { %1538 = vmatpush.msra.mxu3 %v667_v34  ;;  %v647_v62 = vld [vmem:[#allocation7 + $0x48] sm:$0xff]  ;;  %v690_v34 = vld [vmem:[#allocation8 + $0xa0] sm:$0xff] }
 0x7fc   : > { %v1941_v60 = vpop.permute.xlu0 %1940 }
 0x7fd   : > { %v1942_v63 = vunpack.i.l.bf16 %v1941_v60  ;;  %v1943_v0 = vunpack.i.h.bf16 %v1941_v60  ;;  %v646_v60 = vld [vmem:[#allocation7 + $0x40] sm:$0xff] }
 0x7fe   : > { %1528 = vmatpush.msrb.mxu2 %v646_v60 }
 0x7ff   : > { %1447 = vmatpush.msrb.mxu0 %v1942_v63  ;;  %v644_v63 = vld [vmem:[#allocation7 + $0x30] sm:$0xff] }
 0x800   : > { %1529 = vmatpush.msrb.mxu2 %v644_v63 }
 0x801   : > { %1448 = vmatpush.msrb.mxu0 %v1943_v0  ;;  %v645_v0 = vld [vmem:[#allocation7 + $0x38] sm:$0xff] }
 0x802   : > { %1830 = vmatmul.msk.f32.vlgmr.msrb.gmra.mxu0 %vm1316_vm9, %v1360_v1  ;;  %v1381_v2 = vpop.f32.mrf.mxu2  ;;  %v642_v1 = vld [vmem:[#allocation7 + $0x20] sm:$0xff] }
 0x803   : > { %1530 = vmatpush.msrb.mxu2 %v642_v1  ;;  %1560 = vmatpush.msra.mxu0 %v685_v7 }
 0x805   : > { %1561 = vmatpush.msra.mxu0 %v684_v9 }
 0x807   : > { %1562 = vmatpush.msra.mxu0 %v683_v13 }
 0x809   : > { %1563 = vmatpush.msra.mxu0 %v682_v16 }
 0x80b   : > { %1564 = vmatpush.msra.mxu0 %v681_v59 }
 0x80d   : > { %1565 = vmatpush.msra.mxu0 %v680_v18 }
 0x86e   : > { %v1404_v3 = vpop.f32.mrf.mxu2 }
 0x86f   : > { %1454 = vrot.lane.b32.xlu1 %v1404_v3, %s2194_s25  ;;  %v640_v3 = vld [vmem:[#allocation7 + $0x10] sm:$0xff] }
 0x870   : > { %1531 = vmatpush.msrb.mxu2 %v640_v3 }
 0x872   : > { %v1427_v4 = vpop.f32.mrf.mxu3 }
 0x873   : > { %1458 = vrot.lane.b32.xlu2 %v1427_v4, %s2195_s11  ;;  %v641_v4 = vld [vmem:[#allocation7 + $0x18] sm:$0xff] }
 0x87f   : > { %v1450_v5 = vpop.f32.mrf.mxu0 }
 0x880   : > { %1462 = vrot.lane.b32.xlu1 %v1450_v5, %s2196_s20  ;;  %v638_v5 = vld [vmem:[#allocation7] sm:$0xff] }
 0x881   : > { %1532 = vmatpush.msrb.mxu2 %v638_v5 }
 0x8cd   : > { %v1459_v22 = vpop.permute.xlu2 %1458 }
 0x8e1   : > { %v1455_v20 = vpop.permute.xlu1 %1454 }
 0x8e2   : > { %v1465_v21 = vsel %vm794_vm0, %v1381_v2, %v1455_v20  ;;  %v643_v2 = vld [vmem:[#allocation7 + $0x28] sm:$0xff] }
 0x8e3   : > { %v1466_v23 = vsel %vm1041_vm3, %v1465_v21, %v1459_v22  ;;  %v679_v20 = vld [vmem:[#allocation8 + $0x48] sm:$0xff] }
 0x8e4   : > { %v695_v21 = vld [vmem:[#allocation8 + $0xc8] sm:$0xff]  ;;  %1566 = vmatpush.msra.mxu0 %v679_v20 }
 0x8e5   : > { %1586 = vmatpush.msrb.mxu1 %v695_v21 }
 0x8f2   : > { %v1463_v25 = vpop.permute.xlu1 %1462 }
 0x8f3   : > { %v1467_v26 = vsel %vm1043_vm4, %v1466_v23, %v1463_v25  ;;  %v678_v23 = vld [vmem:[#allocation8 + $0x40] sm:$0xff] }
 0x8f4   : > { %1485 = vmatmul.f32.vlgmr.msra.gmra.mxu1 %v1467_v26  ;;  %v694_v25 = vld [vmem:[#allocation8 + $0xc0] sm:$0xff]  ;;  %1567 = vmatpush.msra.mxu0 %v678_v23 }
 0x8f5   : > { %1587 = vmatpush.msrb.mxu1 %v694_v25 }
 0x971   : > { %v1486_v33 = vpop.f32.mrf.mxu1 }
 0x972   : > { %v1487_v29 = vadd.f32 %v1486_v33, %v1468_v28  ;;  %v677_v28 = vld [vmem:[#allocation8 + $0x38] sm:$0xff] }
 0x973   : > { %v693_v33 = vld [vmem:[#allocation8 + $0xb8] sm:$0xff]  ;;  %1568 = vmatpush.msra.mxu0 %v677_v28 }
 0x974   : > { %v1489_v31 = vadd.f32 %v1487_v29, %v2455_v35  ;;  %v665_v35 = vld [vmem:[#allocation7 + $0xd8] sm:$0xff]  ;;  %1588 = vmatpush.msrb.mxu1 %v693_v33 }
 0x975   : > { %1539 = vmatpush.msra.mxu3 %v665_v35  ;;  %v1510_v35 = vperm.slane %v2515_v27, 6  ;;  %v705_v27 = vld [vmem:[%s2579_s9 + $0x18] sm:$0xf] }
 0x976   : > { %1490 = vadd.xlane.f32.xlu0 %v1489_v31  ;;  %1589 = vmatpush.msrb.mxu1 %v692_v36  ;;  %v1515_v57 = vperm.slane %v705_v27, 0  ;;  %v1559_v3 = vperm.slane %v705_v27, 1  ;;  %v1621_v20 = vperm.slane %v705_v27, 2 }
 0x977   : > { %1540 = vmatpush.msra.mxu3 %v663_v43  ;;  %v689_v43 = vld [vmem:[#allocation8 + $0x98] sm:$0xff] }
 0x979   : > { %1541 = vmatpush.msra.mxu3 %v661_v45 }
 0x97b   : > { %1542 = vmatpush.msra.mxu3 %v659_v47 }
 0x97d   : > { %1543 = vmatpush.msra.mxu3 %v657_v49 }
 0x97f   : > { %1544 = vmatpush.msra.mxu3 %v655_v51  ;;  %v688_v51 = vld [vmem:[#allocation8 + $0x90] sm:$0xff] }
 0x981   : > { %1545 = vmatpush.msra.mxu3 %v653_v54  ;;  %v687_v54 = vld [vmem:[#allocation8 + $0x88] sm:$0xff] }
 0x983   : > { %1546 = vmatpush.msra.mxu3 %v651_v56  ;;  %v706_v56 = vld [vmem:[%s2579_s9 + $0x20] sm:$0xf] }
 0x985   : > { %1547 = vmatpush.msra.mxu3 %v649_v58  ;;  %v1516_v58 = vperm.slane %v706_v56, 0 }
 0x987   : > { %1548 = vmatpush.msra.mxu3 %v647_v62 }
 0x989   : > { %1549 = vmatpush.msra.mxu3 %v645_v0 }
 0x98b   : > { %1550 = vmatpush.msra.mxu3 %v643_v2 }
 0x98d   : > { %1551 = vmatpush.msra.mxu3 %v641_v4 }
 0x98f   : > { %1552 = vmatpush.msra.mxu3 %v639_v6 }
 0x9e9   : > { %v1491_v24 = vpop.xlane.xlu0 %1490 }
 0x9ea   : > { %v1492_v32 = vmul.f32 %v1491_v24, %v2434_v52  ;;  %v675_v24 = vld [vmem:[#allocation8 + $0x28] sm:$0xff] }
 0x9ec   : > { %v2520_v38 = vsub.f32 %v1489_v31, %v1492_v32  ;;  %v676_v31 = vld [vmem:[#allocation8 + $0x30] sm:$0xff]  ;;  %v691_v32 = vld [vmem:[#allocation8 + $0xa8] sm:$0xff] }
 0x9ed   : > { %1569 = vmatpush.msra.mxu0 %v676_v31  ;;  %1590 = vmatpush.msrb.mxu1 %v691_v32 }
 0x9ee   : > { %v1494_v39 = vmul.f32 %v2520_v38, %v2520_v38 }
 0x9ef   : > { %1570 = vmatpush.msra.mxu0 %v675_v24  ;;  %1591 = vmatpush.msrb.mxu1 %v690_v34 }
 0x9f0   : > { %1495 = vadd.xlane.f32.xlu2 %v1494_v39 }
 0x9f1   : > { %1571 = vmatpush.msra.mxu0 %v674_v40  ;;  %1592 = vmatpush.msrb.mxu1 %v689_v43 }
 0x9f3   : > { %1572 = vmatpush.msra.mxu0 %v673_v42  ;;  %1593 = vmatpush.msrb.mxu1 %v688_v51 }
 0x9f5   : > { %1573 = vmatpush.msra.mxu0 %v672_v50  ;;  %1594 = vmatpush.msrb.mxu1 %v687_v54 }
 0x9f7   : > { %1574 = vmatpush.msra.mxu0 %v671_v53 }
 0x9f9   : > { %1575 = vmatpush.msra.mxu0 %v670_v55 }
 0xa63   : > { %v1496_v10 = vpop.xlane.xlu2 %1495 }
 0xa64   : > { %v1497_v12 = vmul.f32 %v1496_v10, %v2434_v52 }
 0xa66   : > { %v1498_v15 = vadd.f32 1e-05, %v1497_v12 }
 0xa68   : > { %1983 = vrsqrt.f32 %v1498_v15  ;;  %vm1505_vm11 = vweird.f32 %v1498_v15 }
 0xa6e   : > { %v1984_v22 = vpop.eup %1983 }
 0xa6f   : > { %v1500_v26 = vmul.f32 %v1984_v22, %v1498_v15  ;;  %vm1506_vm10 = vweird.f32 %v1984_v22 }
 0xa70   : > { %vm1507_vm12 = vmor %vm1505_vm11, %vm1506_vm10 }
 0xa71   : > { %v1501_v29 = vmul.f32 %v1984_v22, %v1500_v26 }
 0xa73   : > { %v1502_v37 = vmul.f32 0.5, %v1501_v29 }
 0xa75   : > { %v1503_v39 = vsub.f32 1.5, %v1502_v37 }
 0xa77   : > { %v1504_v41 = vmul.f32 %v1984_v22, %v1503_v39 }
 0xa79   : > { %v1508_v44 = vsel %vm1507_vm12, %v1984_v22, %v1504_v41  ;;  %v1623_v22 = vperm.slane %v705_v27, 3 }
 0xa7a   : > { %v1509_v45 = vmul.f32 %v1508_v44, %v2520_v38  ;;  %v686_v38 = vld [vmem:[#allocation8 + $0x80] sm:$0xff] }
 0xa7b   : > { %1595 = vmatpush.msrb.mxu1 %v686_v38 }
 0xa7c   : > { %v1511_v47 = vmul.f32 %v1510_v35, %v1509_v45 }
 0xa7e   : > { %v1513_v48 = vadd.f32 %v1512_v46, %v1511_v47 }
 0xa80   : > { %v1514_v49 = vmul.f32 %v1513_v48, %v2452_v30 }
 0xa82   : > { %1533 = vmatmul.f32.vlgmr.msrb.gmra.mxu2 %v1514_v49  ;;  %1553 = vmatmul.f32.vlgmr.msra.gmra.mxu3 %v1514_v49 }
 0xb05   : > { %v1534_v60 = vpop.f32.mrf.mxu2  ;;  %v1554_v62 = vpop.f32.mrf.mxu3 }
 0xb06   : > { %v1535_v63 = vadd.f32 %v1534_v60, %v1515_v57  ;;  %v1555_v0 = vadd.f32 %v1554_v62, %v1516_v58 }
 0xb08   : > { %v1557_v1 = vmax.f32 %v1535_v63, 0.0  ;;  %v1558_v2 = vmax.f32 %v1555_v0, 0.0 }
 0xb0a   : > { %1576 = vmatmul.f32.vlgmr.msra.gmra.mxu0 %v1557_v1  ;;  %1596 = vmatmul.f32.vlgmr.msrb.gmra.mxu1 %v1558_v2 }
 0xb87   : > { %v1577_v4 = vpop.f32.mrf.mxu0  ;;  %v1597_v6 = vpop.f32.mrf.mxu1 }
 0xb88   : > { %v1578_v5 = vadd.f32 %v1577_v4, %v1559_v3 }
 0xb8a   : > { %v1598_v7 = vadd.f32 %v1597_v6, %v1578_v5 }
 0xb8c   : > { %v1600_v8 = vadd.f32 %v1598_v7, %v1514_v49 }
 0xb8e   : > { %1601 = vadd.xlane.f32.xlu1 %v1600_v8 }
 0xc01   : > { %v1602_v9 = vpop.xlane.xlu1 %1601 }
 0xc02   : > { %v1603_v10 = vmul.f32 %v1602_v9, %v2434_v52 }
 0xc04   : > { %v1604_v11 = vsub.f32 %v1600_v8, %v1603_v10 }
 0xc06   : > { %v1605_v12 = vmul.f32 %v1604_v11, %v1604_v11 }
 0xc08   : > { %1606 = vadd.xlane.f32.xlu2 %v1605_v12 }
 0xc7b   : > { %v1607_v13 = vpop.xlane.xlu2 %1606 }
 0xc7c   : > { %v1608_v14 = vmul.f32 %v1607_v13, %v2434_v52 }
 0xc7e   : > { %v1609_v15 = vadd.f32 1e-05, %v1608_v14 }
 0xc80   : > { %1985 = vrsqrt.f32 %v1609_v15  ;;  %vm1616_vm14 = vweird.f32 %v1609_v15 }
 0xc86   : > { %v1986_v16 = vpop.eup %1985 }
 0xc87   : > { %v1611_v17 = vmul.f32 %v1986_v16, %v1609_v15  ;;  %vm1617_vm13 = vweird.f32 %v1986_v16 }
 0xc88   : > { %vm1618_vm15 = vmor %vm1616_vm14, %vm1617_vm13 }
 0xc89   : > { %v1612_v59 = vmul.f32 %v1986_v16, %v1611_v17 }
 0xc8b   : > { %v1613_v61 = vmul.f32 0.5, %v1612_v59 }
 0xc8d   : > { %v1614_v18 = vsub.f32 1.5, %v1613_v61 }
 0xc8f   : > { %v1615_v19 = vmul.f32 %v1986_v16, %v1614_v18 }
 0xc91   : > { %v1619_v21 = vsel %vm1618_vm15, %v1986_v16, %v1615_v19 }
 0xc92   : > { %v1620_v23 = vmul.f32 %v1619_v21, %v1604_v11 }
 0xc94   : > { %v1622_v52 = vmul.f32 %v1621_v20, %v1620_v23 }
 0xc96   : > { %v1624_v25 = vadd.f32 %v1623_v22, %v1622_v52 }
 0xc98   : > { %v1625_v26 = vmul.f32 %v1624_v25, %v2452_v30 }
 0xc9a   : > { %1626 = vst [vmem:[%s467_s19] sm:$0xff] %v1625_v26 }
 0xc9b   : > { %2135 = shalt.err (!%p2132_p8)
}
 0xc9c   : > { %1852 = dma.vmem_to_hbm [thread:$0]  (%p2293_p5), %s1641_s22, 128, %s1643_s23, %s1628_s17  }
 0xc9d PF: > { %s2605_s20 = sld [smem:[#allocation17_spill]] }
 0xc9e   : > { %s2606_s12 = sld [smem:[#allocation15_spill]] }
 0xca3   : > { %p1879_p9 = scmp.ge.s32.totalorder %s2605_s20, 2 }
 0xca4   : > { %s1654_s28 = sand.u32 1, %s2606_s12  }
 0xca5   : > { %p1868_p10 = pnand %p1879_p9, %p2297_p6  ;;  %s1655_s30 = scalar_lea.sflag [#allocation4], %s1654_s28 }
 0xca7   : > { %p1869_p11 = pneg %p1868_p10 }
 0xca9   : > { %2165 = dma.done.wait (%p1869_p11), %s1655_s30, 128  }
 0xcaa   : > { %2167 = vsyncadd (%p1869_p11), %s1655_s30, 4294967168  ;;  %s2608_s16 = sld [smem:[#allocation18_spill]]  ;;  %s2611_s13 = smov %s2174_s14 }
 0xcab   : > { %s2609_s27 = sld [smem:[#allocation16_spill]] }
 0xcac   : > { %s2610_s15 = sld [smem:[#allocation19_spill]] }
 0xcb0   : > { %p23_p12 = scmp.ge.s32.totalorder %s2608_s16, 4  }
 0xcb1   : > { %s2612_s14 = smov %s2609_s27 }
 0xcb2   :  { %25 = sbr.rel (!%p23_p12) target bundleno = 9 (0x9), region = 124 }
 0xcb7   :  { %1661 = vsyncpa [#allocation3], 1 }
 0xcb8   :  { %1663 = vsyncpa [#allocation3 + $0x1], 1 }
 0xcb9   :  { %1664 = vsyncpa [#allocation6], 1 }
 0xcba   :  { %1665 = vsyncpa [#allocation9], 1 }
 0xcbb   :  { %1666 = vsyncpa [#allocation4], 1 }
 0xcbc   :  { %1668 = vsyncpa [#allocation4 + $0x1], 1 }

</bundles_post_ra>
